<compile_context>
chip_gen: v5e
topology: v5e:2x2
jax: 0.10.0
libtpu: 0.0.40
codegen_flags: <defaults>
</compile_context>

<pallas_src>
import functools

import jax
import jax.numpy as jnp
from jax.experimental import pallas as pl
from jax.experimental.pallas import tpu as pltpu

KSIZE = 7
PAD = 3  # padding = 3 for kernel_size = 7


def _spatial_attention_kernel(x_ref, w_ref, row_ref, col_ref, o_ref, *, H, W):
    # x_ref  : (C, N, S) VMEM, S = H*W (spatial dims flattened onto lanes)
    # w_ref  : (2*7*7,)  SMEM, conv weights, OIHW order, 1/C folded into ch 0
    # row_ref: (N, S)    VMEM int32, row index of each flattened position
    # col_ref: (N, S)    VMEM int32, column index of each flattened position
    # o_ref  : (N, S)    VMEM, sigmoid(conv) attention map
    C, N, S = x_ref.shape

    x = x_ref[...].astype(jnp.float32)            # (C, N, S)
    sum_map = jnp.sum(x, axis=0)                  # (N, S); 1/C lives in weights
    max_map = jnp.max(x, axis=0)                  # (N, S)

    row = row_ref[...]                            # (N, S) int32
    col = col_ref[...]                            # (N, S) int32

    # ---- Stage 1: row (dh) shifts, hoisted out of the 98-term MAC ----------
    # A shift by `a` rows is a lane roll by a*W in the flattened layout; rows
    # that fall outside [0, H) are zeroed, reproducing the conv zero padding.
    rm0 = []  # row-shifted, row-masked maps for conv input channel 0 (mean)
    rm1 = []  # ... channel 1 (max)
    for dh in range(KSIZE):
        a = dh - PAD
        if a == 0:
            rm0.append(sum_map)
            rm1.append(max_map)
        else:
            hmask = jnp.where((row + a >= 0) & (row + a < H), 1.0, 0.0)
            rm0.append(pltpu.roll(sum_map, (-a * W) % S, axis=1) * hmask)
            rm1.append(pltpu.roll(max_map, (-a * W) % S, axis=1) * hmask)

    # ---- Stage 2: per column offset, weighted sum over (c, dh), then one ----
    # lane roll + column-boundary mask.  Partial accumulators keep the add
    # chains short so the VALU slots can pipeline.
    out_even = None
    out_odd = None
    for dw in range(KSIZE):
        b = dw - PAD
        z0 = None
        z1 = None
        for dh in range(KSIZE):
            w0 = w_ref[dh * KSIZE + dw]                      # channel 0 tap
            w1 = w_ref[KSIZE * KSIZE + dh * KSIZE + dw]      # channel 1 tap
            t0 = w0 * rm0[dh]
            t1 = w1 * rm1[dh]
            z0 = t0 if z0 is None else z0 + t0
            z1 = t1 if z1 is None else z1 + t1
        z = z0 + z1
        if b != 0:
            z = pltpu.roll(z, (-b) % S, axis=1)
            wmask = jnp.where((col + b >= 0) & (col + b < W), 1.0, 0.0)
            z = z * wmask
        if dw % 2 == 0:
            out_even = z if out_even is None else out_even + z
        else:
            out_odd = z if out_odd is None else out_odd + z

    o_ref[...] = jax.nn.sigmoid(out_even + out_odd).astype(o_ref.dtype)


def spatial_attention(x, w):
    """x: (N, C, H, W) f32/bf16; w: (1, 2, 7, 7) OIHW conv weights (no bias).

    Returns sigmoid(conv2d([mean_c(x); max_c(x)], w, padding=3)): (N, 1, H, W).
    """
    N, C, H, W = x.shape
    assert w.shape == (1, 2, KSIZE, KSIZE), w.shape
    S = H * W

    # Fold 1/C of the channel mean into the channel-0 weights so the kernel
    # only needs a channel sum; flatten to (98,) SMEM scalars in OIHW order.
    scale = jnp.array([1.0 / C, 1.0], dtype=jnp.float32).reshape(1, 2, 1, 1)
    w_flat = (w.astype(jnp.float32) * scale).reshape(-1)

    # Lane-dense, channel-leading view: (C, N, H*W).
    x_cns = jnp.transpose(x, (1, 0, 2, 3)).reshape(C, N, S)

    # Static (row, col) index maps for the conv boundary masks (precomputed so
    # the kernel never needs vector integer div/mod).
    row_idx = jnp.broadcast_to(
        jnp.repeat(jnp.arange(H, dtype=jnp.int32), W), (N, S))
    col_idx = jnp.broadcast_to(
        jnp.tile(jnp.arange(W, dtype=jnp.int32), H), (N, S))

    out = pl.pallas_call(
        functools.partial(_spatial_attention_kernel, H=H, W=W),
        out_shape=jax.ShapeDtypeStruct((N, S), x.dtype),
        grid=(1,),  # whole (small) batch in one step: no per-batch grid cost
        in_specs=[
            pl.BlockSpec((C, N, S), lambda i: (0, 0, 0)),
            pl.BlockSpec(memory_space=pltpu.MemorySpace.SMEM),
            pl.BlockSpec((N, S), lambda i: (0, 0)),
            pl.BlockSpec((N, S), lambda i: (0, 0)),
        ],
        out_specs=pl.BlockSpec((N, S), lambda i: (0, 0)),
    )(x_cns, w_flat, row_idx, col_idx)

    # TODO(synk): for large feature maps (v7x 64 MiB VMEM) add a C / H-halo
    # tiling grid, and fuse the downstream `x * attention` apply to halve HBM
    # traffic; not needed at these demo shapes.
    return out.reshape(N, 1, H, W)


def _reference(x, w):
    avg = jnp.mean(x, axis=1, keepdims=True)
    mx = jnp.max(x, axis=1, keepdims=True)
    xc = jnp.concatenate([avg, mx], axis=1)
    out = jax.lax.conv_general_dilated(
        xc, w, window_strides=(1, 1), padding=((PAD, PAD), (PAD, PAD)),
        dimension_numbers=("NCHW", "OIHW", "NCHW"),
        precision=jax.lax.Precision.HIGHEST)
    return jax.nn.sigmoid(out)


if __name__ == "__main__":
    key = jax.random.PRNGKey(0)
    k_case1, k_case2 = jax.random.split(key)

    def run_case(case_key, N, C, H, W):
        kx, kw = jax.random.split(case_key)
        x = jax.random.normal(kx, (N, C, H, W), dtype=jnp.float32)
        # Deterministic synthetic conv weights: nn.Conv2d(2, 1, 7, bias=False)
        w = 0.1 * jax.random.normal(kw, (1, 2, KSIZE, KSIZE), dtype=jnp.float32)

        out = jax.block_until_ready(spatial_attention(x, w))
        ref = jax.block_until_ready(_reference(x, w))

        assert out.shape == (N, 1, H, W), out.shape
        max_err = float(jnp.max(jnp.abs(out - ref)))
        assert max_err < 1e-4, (
            f"mismatch vs reference at ({N},{C},{H},{W}): {max_err}")

    # Module-consistent small shape, plus a second shape to validate the
    # roll/mask conv rewrite at different H/W/C.
    run_case(k_case1, 2, 4, 16, 16)
    run_case(k_case2, 1, 8, 8, 32)

    print("KERNEL_OK")
</pallas_src>

<mosaic_0001>
module attributes {stable_mosaic.version = 11 : i64} {
  func.func @_spatial_attention_kernel(%arg0: i32, %arg1: memref<4x2x256xf32, #tpu.memory_space<vmem>>, %arg2: memref<98xf32, #tpu.memory_space<smem>>, %arg3: memref<2x256xi32, #tpu.memory_space<vmem>>, %arg4: memref<2x256xi32, #tpu.memory_space<vmem>>, %arg5: memref<2x256xf32, #tpu.memory_space<vmem>>) attributes {dimension_semantics = [#tpu.dimension_semantics<arbitrary>], iteration_bounds = array<i64: 1>, scalar_prefetch = 0 : i64, scratch_operands = 0 : i64, tpu.core_type = #tpu.core_type<tc>, window_params = [{pipeline_mode = #tpu.pipeline_mode<synchronous>, transform_indices = @transform_0, window_bounds = array<i64: 4, 2, 256>}, {transform_indices = @transform_1, window_bounds = array<i64: 98>}, {pipeline_mode = #tpu.pipeline_mode<synchronous>, transform_indices = @transform_2, window_bounds = array<i64: 2, 256>}, {pipeline_mode = #tpu.pipeline_mode<synchronous>, transform_indices = @transform_3, window_bounds = array<i64: 2, 256>}, {pipeline_mode = #tpu.pipeline_mode<synchronous>, transform_indices = @transform_4, window_bounds = array<i64: 2, 256>}]} {
    %c0 = arith.constant 0 : index
    %c0_0 = arith.constant 0 : index
    %c0_1 = arith.constant 0 : index
    %0 = vector.load %arg1[%c0, %c0_0, %c0_1] : memref<4x2x256xf32, #tpu.memory_space<vmem>>, vector<4x2x256xf32>
    %cst = arith.constant dense<0.000000e+00> : vector<2x256xf32>
    %1 = vector.multi_reduction <add>, %0, %cst [0] : vector<4x2x256xf32> to vector<2x256xf32>
    %cst_2 = arith.constant dense<0xFF800000> : vector<2x256xf32>
    %2 = vector.multi_reduction <maximumf>, %0, %cst_2 [0] : vector<4x2x256xf32> to vector<2x256xf32>
    %c0_3 = arith.constant 0 : index
    %c0_4 = arith.constant 0 : index
    %3 = vector.load %arg3[%c0_3, %c0_4] : memref<2x256xi32, #tpu.memory_space<vmem>>, vector<2x256xi32>
    %c0_5 = arith.constant 0 : index
    %c0_6 = arith.constant 0 : index
    %4 = vector.load %arg4[%c0_5, %c0_6] : memref<2x256xi32, #tpu.memory_space<vmem>>, vector<2x256xi32>
    %c-3_i32 = arith.constant -3 : i32
    %5 = vector.broadcast %c-3_i32 : i32 to vector<2x256xi32>
    %6 = arith.addi %3, %5 : vector<2x256xi32>
    %c0_i32 = arith.constant 0 : i32
    %7 = vector.broadcast %c0_i32 : i32 to vector<2x256xi32>
    %8 = arith.cmpi sge, %6, %7 : vector<2x256xi32>
    %c-3_i32_7 = arith.constant -3 : i32
    %9 = vector.broadcast %c-3_i32_7 : i32 to vector<2x256xi32>
    %10 = arith.addi %3, %9 : vector<2x256xi32>
    %c16_i32 = arith.constant 16 : i32
    %11 = vector.broadcast %c16_i32 : i32 to vector<2x256xi32>
    %12 = arith.cmpi slt, %10, %11 : vector<2x256xi32>
    %13 = arith.andi %8, %12 : vector<2x256xi1>
    %cst_8 = arith.constant 1.000000e+00 : f32
    %cst_9 = arith.constant 0.000000e+00 : f32
    %14 = vector.broadcast %cst_8 : f32 to vector<2x256xf32>
    %15 = vector.broadcast %cst_9 : f32 to vector<2x256xf32>
    %16 = arith.select %13, %14, %15 : vector<2x256xi1>, vector<2x256xf32>
    %c48_i32 = arith.constant 48 : i32
    %17 = tpu.dynamic_rotate %1 by %c48_i32 dim 1 : vector<2x256xf32>, i32 -> vector<2x256xf32>
    %18 = arith.mulf %17, %16 : vector<2x256xf32>
    %c48_i32_10 = arith.constant 48 : i32
    %19 = tpu.dynamic_rotate %2 by %c48_i32_10 dim 1 : vector<2x256xf32>, i32 -> vector<2x256xf32>
    %20 = arith.mulf %19, %16 : vector<2x256xf32>
    %c-2_i32 = arith.constant -2 : i32
    %21 = vector.broadcast %c-2_i32 : i32 to vector<2x256xi32>
    %22 = arith.addi %3, %21 : vector<2x256xi32>
    %c0_i32_11 = arith.constant 0 : i32
    %23 = vector.broadcast %c0_i32_11 : i32 to vector<2x256xi32>
    %24 = arith.cmpi sge, %22, %23 : vector<2x256xi32>
    %c-2_i32_12 = arith.constant -2 : i32
    %25 = vector.broadcast %c-2_i32_12 : i32 to vector<2x256xi32>
    %26 = arith.addi %3, %25 : vector<2x256xi32>
    %c16_i32_13 = arith.constant 16 : i32
    %27 = vector.broadcast %c16_i32_13 : i32 to vector<2x256xi32>
    %28 = arith.cmpi slt, %26, %27 : vector<2x256xi32>
    %29 = arith.andi %24, %28 : vector<2x256xi1>
    %cst_14 = arith.constant 1.000000e+00 : f32
    %cst_15 = arith.constant 0.000000e+00 : f32
    %30 = vector.broadcast %cst_14 : f32 to vector<2x256xf32>
    %31 = vector.broadcast %cst_15 : f32 to vector<2x256xf32>
    %32 = arith.select %29, %30, %31 : vector<2x256xi1>, vector<2x256xf32>
    %c32_i32 = arith.constant 32 : i32
    %33 = tpu.dynamic_rotate %1 by %c32_i32 dim 1 : vector<2x256xf32>, i32 -> vector<2x256xf32>
    %34 = arith.mulf %33, %32 : vector<2x256xf32>
    %c32_i32_16 = arith.constant 32 : i32
    %35 = tpu.dynamic_rotate %2 by %c32_i32_16 dim 1 : vector<2x256xf32>, i32 -> vector<2x256xf32>
    %36 = arith.mulf %35, %32 : vector<2x256xf32>
    %c-1_i32 = arith.constant -1 : i32
    %37 = vector.broadcast %c-1_i32 : i32 to vector<2x256xi32>
    %38 = arith.addi %3, %37 : vector<2x256xi32>
    %c0_i32_17 = arith.constant 0 : i32
    %39 = vector.broadcast %c0_i32_17 : i32 to vector<2x256xi32>
    %40 = arith.cmpi sge, %38, %39 : vector<2x256xi32>
    %c-1_i32_18 = arith.constant -1 : i32
    %41 = vector.broadcast %c-1_i32_18 : i32 to vector<2x256xi32>
    %42 = arith.addi %3, %41 : vector<2x256xi32>
    %c16_i32_19 = arith.constant 16 : i32
    %43 = vector.broadcast %c16_i32_19 : i32 to vector<2x256xi32>
    %44 = arith.cmpi slt, %42, %43 : vector<2x256xi32>
    %45 = arith.andi %40, %44 : vector<2x256xi1>
    %cst_20 = arith.constant 1.000000e+00 : f32
    %cst_21 = arith.constant 0.000000e+00 : f32
    %46 = vector.broadcast %cst_20 : f32 to vector<2x256xf32>
    %47 = vector.broadcast %cst_21 : f32 to vector<2x256xf32>
    %48 = arith.select %45, %46, %47 : vector<2x256xi1>, vector<2x256xf32>
    %c16_i32_22 = arith.constant 16 : i32
    %49 = tpu.dynamic_rotate %1 by %c16_i32_22 dim 1 : vector<2x256xf32>, i32 -> vector<2x256xf32>
    %50 = arith.mulf %49, %48 : vector<2x256xf32>
    %c16_i32_23 = arith.constant 16 : i32
    %51 = tpu.dynamic_rotate %2 by %c16_i32_23 dim 1 : vector<2x256xf32>, i32 -> vector<2x256xf32>
    %52 = arith.mulf %51, %48 : vector<2x256xf32>
    %c1_i32 = arith.constant 1 : i32
    %53 = vector.broadcast %c1_i32 : i32 to vector<2x256xi32>
    %54 = arith.addi %3, %53 : vector<2x256xi32>
    %c0_i32_24 = arith.constant 0 : i32
    %55 = vector.broadcast %c0_i32_24 : i32 to vector<2x256xi32>
    %56 = arith.cmpi sge, %54, %55 : vector<2x256xi32>
    %c1_i32_25 = arith.constant 1 : i32
    %57 = vector.broadcast %c1_i32_25 : i32 to vector<2x256xi32>
    %58 = arith.addi %3, %57 : vector<2x256xi32>
    %c16_i32_26 = arith.constant 16 : i32
    %59 = vector.broadcast %c16_i32_26 : i32 to vector<2x256xi32>
    %60 = arith.cmpi slt, %58, %59 : vector<2x256xi32>
    %61 = arith.andi %56, %60 : vector<2x256xi1>
    %cst_27 = arith.constant 1.000000e+00 : f32
    %cst_28 = arith.constant 0.000000e+00 : f32
    %62 = vector.broadcast %cst_27 : f32 to vector<2x256xf32>
    %63 = vector.broadcast %cst_28 : f32 to vector<2x256xf32>
    %64 = arith.select %61, %62, %63 : vector<2x256xi1>, vector<2x256xf32>
    %c240_i32 = arith.constant 240 : i32
    %65 = tpu.dynamic_rotate %1 by %c240_i32 dim 1 : vector<2x256xf32>, i32 -> vector<2x256xf32>
    %66 = arith.mulf %65, %64 : vector<2x256xf32>
    %c240_i32_29 = arith.constant 240 : i32
    %67 = tpu.dynamic_rotate %2 by %c240_i32_29 dim 1 : vector<2x256xf32>, i32 -> vector<2x256xf32>
    %68 = arith.mulf %67, %64 : vector<2x256xf32>
    %c2_i32 = arith.constant 2 : i32
    %69 = vector.broadcast %c2_i32 : i32 to vector<2x256xi32>
    %70 = arith.addi %3, %69 : vector<2x256xi32>
    %c0_i32_30 = arith.constant 0 : i32
    %71 = vector.broadcast %c0_i32_30 : i32 to vector<2x256xi32>
    %72 = arith.cmpi sge, %70, %71 : vector<2x256xi32>
    %c2_i32_31 = arith.constant 2 : i32
    %73 = vector.broadcast %c2_i32_31 : i32 to vector<2x256xi32>
    %74 = arith.addi %3, %73 : vector<2x256xi32>
    %c16_i32_32 = arith.constant 16 : i32
    %75 = vector.broadcast %c16_i32_32 : i32 to vector<2x256xi32>
    %76 = arith.cmpi slt, %74, %75 : vector<2x256xi32>
    %77 = arith.andi %72, %76 : vector<2x256xi1>
    %cst_33 = arith.constant 1.000000e+00 : f32
    %cst_34 = arith.constant 0.000000e+00 : f32
    %78 = vector.broadcast %cst_33 : f32 to vector<2x256xf32>
    %79 = vector.broadcast %cst_34 : f32 to vector<2x256xf32>
    %80 = arith.select %77, %78, %79 : vector<2x256xi1>, vector<2x256xf32>
    %c224_i32 = arith.constant 224 : i32
    %81 = tpu.dynamic_rotate %1 by %c224_i32 dim 1 : vector<2x256xf32>, i32 -> vector<2x256xf32>
    %82 = arith.mulf %81, %80 : vector<2x256xf32>
    %c224_i32_35 = arith.constant 224 : i32
    %83 = tpu.dynamic_rotate %2 by %c224_i32_35 dim 1 : vector<2x256xf32>, i32 -> vector<2x256xf32>
    %84 = arith.mulf %83, %80 : vector<2x256xf32>
    %c3_i32 = arith.constant 3 : i32
    %85 = vector.broadcast %c3_i32 : i32 to vector<2x256xi32>
    %86 = arith.addi %3, %85 : vector<2x256xi32>
    %c0_i32_36 = arith.constant 0 : i32
    %87 = vector.broadcast %c0_i32_36 : i32 to vector<2x256xi32>
    %88 = arith.cmpi sge, %86, %87 : vector<2x256xi32>
    %c3_i32_37 = arith.constant 3 : i32
    %89 = vector.broadcast %c3_i32_37 : i32 to vector<2x256xi32>
    %90 = arith.addi %3, %89 : vector<2x256xi32>
    %c16_i32_38 = arith.constant 16 : i32
    %91 = vector.broadcast %c16_i32_38 : i32 to vector<2x256xi32>
    %92 = arith.cmpi slt, %90, %91 : vector<2x256xi32>
    %93 = arith.andi %88, %92 : vector<2x256xi1>
    %cst_39 = arith.constant 1.000000e+00 : f32
    %cst_40 = arith.constant 0.000000e+00 : f32
    %94 = vector.broadcast %cst_39 : f32 to vector<2x256xf32>
    %95 = vector.broadcast %cst_40 : f32 to vector<2x256xf32>
    %96 = arith.select %93, %94, %95 : vector<2x256xi1>, vector<2x256xf32>
    %c208_i32 = arith.constant 208 : i32
    %97 = tpu.dynamic_rotate %1 by %c208_i32 dim 1 : vector<2x256xf32>, i32 -> vector<2x256xf32>
    %98 = arith.mulf %97, %96 : vector<2x256xf32>
    %c208_i32_41 = arith.constant 208 : i32
    %99 = tpu.dynamic_rotate %2 by %c208_i32_41 dim 1 : vector<2x256xf32>, i32 -> vector<2x256xf32>
    %100 = arith.mulf %99, %96 : vector<2x256xf32>
    %c0_42 = arith.constant 0 : index
    %101 = memref.load %arg2[%c0_42] : memref<98xf32, #tpu.memory_space<smem>>
    %c49 = arith.constant 49 : index
    %102 = memref.load %arg2[%c49] : memref<98xf32, #tpu.memory_space<smem>>
    %103 = vector.broadcast %101 : f32 to vector<2x256xf32>
    %104 = arith.mulf %103, %18 : vector<2x256xf32>
    %105 = vector.broadcast %102 : f32 to vector<2x256xf32>
    %106 = arith.mulf %105, %20 : vector<2x256xf32>
    %c7 = arith.constant 7 : index
    %107 = memref.load %arg2[%c7] : memref<98xf32, #tpu.memory_space<smem>>
    %c56 = arith.constant 56 : index
    %108 = memref.load %arg2[%c56] : memref<98xf32, #tpu.memory_space<smem>>
    %109 = vector.broadcast %107 : f32 to vector<2x256xf32>
    %110 = arith.mulf %109, %34 : vector<2x256xf32>
    %111 = vector.broadcast %108 : f32 to vector<2x256xf32>
    %112 = arith.mulf %111, %36 : vector<2x256xf32>
    %113 = arith.addf %104, %110 : vector<2x256xf32>
    %114 = arith.addf %106, %112 : vector<2x256xf32>
    %c14 = arith.constant 14 : index
    %115 = memref.load %arg2[%c14] : memref<98xf32, #tpu.memory_space<smem>>
    %c63 = arith.constant 63 : index
    %116 = memref.load %arg2[%c63] : memref<98xf32, #tpu.memory_space<smem>>
    %117 = vector.broadcast %115 : f32 to vector<2x256xf32>
    %118 = arith.mulf %117, %50 : vector<2x256xf32>
    %119 = vector.broadcast %116 : f32 to vector<2x256xf32>
    %120 = arith.mulf %119, %52 : vector<2x256xf32>
    %121 = arith.addf %113, %118 : vector<2x256xf32>
    %122 = arith.addf %114, %120 : vector<2x256xf32>
    %c21 = arith.constant 21 : index
    %123 = memref.load %arg2[%c21] : memref<98xf32, #tpu.memory_space<smem>>
    %c70 = arith.constant 70 : index
    %124 = memref.load %arg2[%c70] : memref<98xf32, #tpu.memory_space<smem>>
    %125 = vector.broadcast %123 : f32 to vector<2x256xf32>
    %126 = arith.mulf %125, %1 : vector<2x256xf32>
    %127 = vector.broadcast %124 : f32 to vector<2x256xf32>
    %128 = arith.mulf %127, %2 : vector<2x256xf32>
    %129 = arith.addf %121, %126 : vector<2x256xf32>
    %130 = arith.addf %122, %128 : vector<2x256xf32>
    %c28 = arith.constant 28 : index
    %131 = memref.load %arg2[%c28] : memref<98xf32, #tpu.memory_space<smem>>
    %c77 = arith.constant 77 : index
    %132 = memref.load %arg2[%c77] : memref<98xf32, #tpu.memory_space<smem>>
    %133 = vector.broadcast %131 : f32 to vector<2x256xf32>
    %134 = arith.mulf %133, %66 : vector<2x256xf32>
    %135 = vector.broadcast %132 : f32 to vector<2x256xf32>
    %136 = arith.mulf %135, %68 : vector<2x256xf32>
    %137 = arith.addf %129, %134 : vector<2x256xf32>
    %138 = arith.addf %130, %136 : vector<2x256xf32>
    %c35 = arith.constant 35 : index
    %139 = memref.load %arg2[%c35] : memref<98xf32, #tpu.memory_space<smem>>
    %c84 = arith.constant 84 : index
    %140 = memref.load %arg2[%c84] : memref<98xf32, #tpu.memory_space<smem>>
    %141 = vector.broadcast %139 : f32 to vector<2x256xf32>
    %142 = arith.mulf %141, %82 : vector<2x256xf32>
    %143 = vector.broadcast %140 : f32 to vector<2x256xf32>
    %144 = arith.mulf %143, %84 : vector<2x256xf32>
    %145 = arith.addf %137, %142 : vector<2x256xf32>
    %146 = arith.addf %138, %144 : vector<2x256xf32>
    %c42 = arith.constant 42 : index
    %147 = memref.load %arg2[%c42] : memref<98xf32, #tpu.memory_space<smem>>
    %c91 = arith.constant 91 : index
    %148 = memref.load %arg2[%c91] : memref<98xf32, #tpu.memory_space<smem>>
    %149 = vector.broadcast %147 : f32 to vector<2x256xf32>
    %150 = arith.mulf %149, %98 : vector<2x256xf32>
    %151 = vector.broadcast %148 : f32 to vector<2x256xf32>
    %152 = arith.mulf %151, %100 : vector<2x256xf32>
    %153 = arith.addf %145, %150 : vector<2x256xf32>
    %154 = arith.addf %146, %152 : vector<2x256xf32>
    %155 = arith.addf %153, %154 : vector<2x256xf32>
    %c3_i32_43 = arith.constant 3 : i32
    %156 = tpu.dynamic_rotate %155 by %c3_i32_43 dim 1 : vector<2x256xf32>, i32 -> vector<2x256xf32>
    %c-3_i32_44 = arith.constant -3 : i32
    %157 = vector.broadcast %c-3_i32_44 : i32 to vector<2x256xi32>
    %158 = arith.addi %4, %157 : vector<2x256xi32>
    %c0_i32_45 = arith.constant 0 : i32
    %159 = vector.broadcast %c0_i32_45 : i32 to vector<2x256xi32>
    %160 = arith.cmpi sge, %158, %159 : vector<2x256xi32>
    %c-3_i32_46 = arith.constant -3 : i32
    %161 = vector.broadcast %c-3_i32_46 : i32 to vector<2x256xi32>
    %162 = arith.addi %4, %161 : vector<2x256xi32>
    %c16_i32_47 = arith.constant 16 : i32
    %163 = vector.broadcast %c16_i32_47 : i32 to vector<2x256xi32>
    %164 = arith.cmpi slt, %162, %163 : vector<2x256xi32>
    %165 = arith.andi %160, %164 : vector<2x256xi1>
    %cst_48 = arith.constant 1.000000e+00 : f32
    %cst_49 = arith.constant 0.000000e+00 : f32
    %166 = vector.broadcast %cst_48 : f32 to vector<2x256xf32>
    %167 = vector.broadcast %cst_49 : f32 to vector<2x256xf32>
    %168 = arith.select %165, %166, %167 : vector<2x256xi1>, vector<2x256xf32>
    %169 = arith.mulf %156, %168 : vector<2x256xf32>
    %c1 = arith.constant 1 : index
    %170 = memref.load %arg2[%c1] : memref<98xf32, #tpu.memory_space<smem>>
    %c50 = arith.constant 50 : index
    %171 = memref.load %arg2[%c50] : memref<98xf32, #tpu.memory_space<smem>>
    %172 = vector.broadcast %170 : f32 to vector<2x256xf32>
    %173 = arith.mulf %172, %18 : vector<2x256xf32>
    %174 = vector.broadcast %171 : f32 to vector<2x256xf32>
    %175 = arith.mulf %174, %20 : vector<2x256xf32>
    %c8 = arith.constant 8 : index
    %176 = memref.load %arg2[%c8] : memref<98xf32, #tpu.memory_space<smem>>
    %c57 = arith.constant 57 : index
    %177 = memref.load %arg2[%c57] : memref<98xf32, #tpu.memory_space<smem>>
    %178 = vector.broadcast %176 : f32 to vector<2x256xf32>
    %179 = arith.mulf %178, %34 : vector<2x256xf32>
    %180 = vector.broadcast %177 : f32 to vector<2x256xf32>
    %181 = arith.mulf %180, %36 : vector<2x256xf32>
    %182 = arith.addf %173, %179 : vector<2x256xf32>
    %183 = arith.addf %175, %181 : vector<2x256xf32>
    %c15 = arith.constant 15 : index
    %184 = memref.load %arg2[%c15] : memref<98xf32, #tpu.memory_space<smem>>
    %c64 = arith.constant 64 : index
    %185 = memref.load %arg2[%c64] : memref<98xf32, #tpu.memory_space<smem>>
    %186 = vector.broadcast %184 : f32 to vector<2x256xf32>
    %187 = arith.mulf %186, %50 : vector<2x256xf32>
    %188 = vector.broadcast %185 : f32 to vector<2x256xf32>
    %189 = arith.mulf %188, %52 : vector<2x256xf32>
    %190 = arith.addf %182, %187 : vector<2x256xf32>
    %191 = arith.addf %183, %189 : vector<2x256xf32>
    %c22 = arith.constant 22 : index
    %192 = memref.load %arg2[%c22] : memref<98xf32, #tpu.memory_space<smem>>
    %c71 = arith.constant 71 : index
    %193 = memref.load %arg2[%c71] : memref<98xf32, #tpu.memory_space<smem>>
    %194 = vector.broadcast %192 : f32 to vector<2x256xf32>
    %195 = arith.mulf %194, %1 : vector<2x256xf32>
    %196 = vector.broadcast %193 : f32 to vector<2x256xf32>
    %197 = arith.mulf %196, %2 : vector<2x256xf32>
    %198 = arith.addf %190, %195 : vector<2x256xf32>
    %199 = arith.addf %191, %197 : vector<2x256xf32>
    %c29 = arith.constant 29 : index
    %200 = memref.load %arg2[%c29] : memref<98xf32, #tpu.memory_space<smem>>
    %c78 = arith.constant 78 : index
    %201 = memref.load %arg2[%c78] : memref<98xf32, #tpu.memory_space<smem>>
    %202 = vector.broadcast %200 : f32 to vector<2x256xf32>
    %203 = arith.mulf %202, %66 : vector<2x256xf32>
    %204 = vector.broadcast %201 : f32 to vector<2x256xf32>
    %205 = arith.mulf %204, %68 : vector<2x256xf32>
    %206 = arith.addf %198, %203 : vector<2x256xf32>
    %207 = arith.addf %199, %205 : vector<2x256xf32>
    %c36 = arith.constant 36 : index
    %208 = memref.load %arg2[%c36] : memref<98xf32, #tpu.memory_space<smem>>
    %c85 = arith.constant 85 : index
    %209 = memref.load %arg2[%c85] : memref<98xf32, #tpu.memory_space<smem>>
    %210 = vector.broadcast %208 : f32 to vector<2x256xf32>
    %211 = arith.mulf %210, %82 : vector<2x256xf32>
    %212 = vector.broadcast %209 : f32 to vector<2x256xf32>
    %213 = arith.mulf %212, %84 : vector<2x256xf32>
    %214 = arith.addf %206, %211 : vector<2x256xf32>
    %215 = arith.addf %207, %213 : vector<2x256xf32>
    %c43 = arith.constant 43 : index
    %216 = memref.load %arg2[%c43] : memref<98xf32, #tpu.memory_space<smem>>
    %c92 = arith.constant 92 : index
    %217 = memref.load %arg2[%c92] : memref<98xf32, #tpu.memory_space<smem>>
    %218 = vector.broadcast %216 : f32 to vector<2x256xf32>
    %219 = arith.mulf %218, %98 : vector<2x256xf32>
    %220 = vector.broadcast %217 : f32 to vector<2x256xf32>
    %221 = arith.mulf %220, %100 : vector<2x256xf32>
    %222 = arith.addf %214, %219 : vector<2x256xf32>
    %223 = arith.addf %215, %221 : vector<2x256xf32>
    %224 = arith.addf %222, %223 : vector<2x256xf32>
    %c2_i32_50 = arith.constant 2 : i32
    %225 = tpu.dynamic_rotate %224 by %c2_i32_50 dim 1 : vector<2x256xf32>, i32 -> vector<2x256xf32>
    %c-2_i32_51 = arith.constant -2 : i32
    %226 = vector.broadcast %c-2_i32_51 : i32 to vector<2x256xi32>
    %227 = arith.addi %4, %226 : vector<2x256xi32>
    %c0_i32_52 = arith.constant 0 : i32
    %228 = vector.broadcast %c0_i32_52 : i32 to vector<2x256xi32>
    %229 = arith.cmpi sge, %227, %228 : vector<2x256xi32>
    %c-2_i32_53 = arith.constant -2 : i32
    %230 = vector.broadcast %c-2_i32_53 : i32 to vector<2x256xi32>
    %231 = arith.addi %4, %230 : vector<2x256xi32>
    %c16_i32_54 = arith.constant 16 : i32
    %232 = vector.broadcast %c16_i32_54 : i32 to vector<2x256xi32>
    %233 = arith.cmpi slt, %231, %232 : vector<2x256xi32>
    %234 = arith.andi %229, %233 : vector<2x256xi1>
    %cst_55 = arith.constant 1.000000e+00 : f32
    %cst_56 = arith.constant 0.000000e+00 : f32
    %235 = vector.broadcast %cst_55 : f32 to vector<2x256xf32>
    %236 = vector.broadcast %cst_56 : f32 to vector<2x256xf32>
    %237 = arith.select %234, %235, %236 : vector<2x256xi1>, vector<2x256xf32>
    %238 = arith.mulf %225, %237 : vector<2x256xf32>
    %c2 = arith.constant 2 : index
    %239 = memref.load %arg2[%c2] : memref<98xf32, #tpu.memory_space<smem>>
    %c51 = arith.constant 51 : index
    %240 = memref.load %arg2[%c51] : memref<98xf32, #tpu.memory_space<smem>>
    %241 = vector.broadcast %239 : f32 to vector<2x256xf32>
    %242 = arith.mulf %241, %18 : vector<2x256xf32>
    %243 = vector.broadcast %240 : f32 to vector<2x256xf32>
    %244 = arith.mulf %243, %20 : vector<2x256xf32>
    %c9 = arith.constant 9 : index
    %245 = memref.load %arg2[%c9] : memref<98xf32, #tpu.memory_space<smem>>
    %c58 = arith.constant 58 : index
    %246 = memref.load %arg2[%c58] : memref<98xf32, #tpu.memory_space<smem>>
    %247 = vector.broadcast %245 : f32 to vector<2x256xf32>
    %248 = arith.mulf %247, %34 : vector<2x256xf32>
    %249 = vector.broadcast %246 : f32 to vector<2x256xf32>
    %250 = arith.mulf %249, %36 : vector<2x256xf32>
    %251 = arith.addf %242, %248 : vector<2x256xf32>
    %252 = arith.addf %244, %250 : vector<2x256xf32>
    %c16 = arith.constant 16 : index
    %253 = memref.load %arg2[%c16] : memref<98xf32, #tpu.memory_space<smem>>
    %c65 = arith.constant 65 : index
    %254 = memref.load %arg2[%c65] : memref<98xf32, #tpu.memory_space<smem>>
    %255 = vector.broadcast %253 : f32 to vector<2x256xf32>
    %256 = arith.mulf %255, %50 : vector<2x256xf32>
    %257 = vector.broadcast %254 : f32 to vector<2x256xf32>
    %258 = arith.mulf %257, %52 : vector<2x256xf32>
    %259 = arith.addf %251, %256 : vector<2x256xf32>
    %260 = arith.addf %252, %258 : vector<2x256xf32>
    %c23 = arith.constant 23 : index
    %261 = memref.load %arg2[%c23] : memref<98xf32, #tpu.memory_space<smem>>
    %c72 = arith.constant 72 : index
    %262 = memref.load %arg2[%c72] : memref<98xf32, #tpu.memory_space<smem>>
    %263 = vector.broadcast %261 : f32 to vector<2x256xf32>
    %264 = arith.mulf %263, %1 : vector<2x256xf32>
    %265 = vector.broadcast %262 : f32 to vector<2x256xf32>
    %266 = arith.mulf %265, %2 : vector<2x256xf32>
    %267 = arith.addf %259, %264 : vector<2x256xf32>
    %268 = arith.addf %260, %266 : vector<2x256xf32>
    %c30 = arith.constant 30 : index
    %269 = memref.load %arg2[%c30] : memref<98xf32, #tpu.memory_space<smem>>
    %c79 = arith.constant 79 : index
    %270 = memref.load %arg2[%c79] : memref<98xf32, #tpu.memory_space<smem>>
    %271 = vector.broadcast %269 : f32 to vector<2x256xf32>
    %272 = arith.mulf %271, %66 : vector<2x256xf32>
    %273 = vector.broadcast %270 : f32 to vector<2x256xf32>
    %274 = arith.mulf %273, %68 : vector<2x256xf32>
    %275 = arith.addf %267, %272 : vector<2x256xf32>
    %276 = arith.addf %268, %274 : vector<2x256xf32>
    %c37 = arith.constant 37 : index
    %277 = memref.load %arg2[%c37] : memref<98xf32, #tpu.memory_space<smem>>
    %c86 = arith.constant 86 : index
    %278 = memref.load %arg2[%c86] : memref<98xf32, #tpu.memory_space<smem>>
    %279 = vector.broadcast %277 : f32 to vector<2x256xf32>
    %280 = arith.mulf %279, %82 : vector<2x256xf32>
    %281 = vector.broadcast %278 : f32 to vector<2x256xf32>
    %282 = arith.mulf %281, %84 : vector<2x256xf32>
    %283 = arith.addf %275, %280 : vector<2x256xf32>
    %284 = arith.addf %276, %282 : vector<2x256xf32>
    %c44 = arith.constant 44 : index
    %285 = memref.load %arg2[%c44] : memref<98xf32, #tpu.memory_space<smem>>
    %c93 = arith.constant 93 : index
    %286 = memref.load %arg2[%c93] : memref<98xf32, #tpu.memory_space<smem>>
    %287 = vector.broadcast %285 : f32 to vector<2x256xf32>
    %288 = arith.mulf %287, %98 : vector<2x256xf32>
    %289 = vector.broadcast %286 : f32 to vector<2x256xf32>
    %290 = arith.mulf %289, %100 : vector<2x256xf32>
    %291 = arith.addf %283, %288 : vector<2x256xf32>
    %292 = arith.addf %284, %290 : vector<2x256xf32>
    %293 = arith.addf %291, %292 : vector<2x256xf32>
    %c1_i32_57 = arith.constant 1 : i32
    %294 = tpu.dynamic_rotate %293 by %c1_i32_57 dim 1 : vector<2x256xf32>, i32 -> vector<2x256xf32>
    %c-1_i32_58 = arith.constant -1 : i32
    %295 = vector.broadcast %c-1_i32_58 : i32 to vector<2x256xi32>
    %296 = arith.addi %4, %295 : vector<2x256xi32>
    %c0_i32_59 = arith.constant 0 : i32
    %297 = vector.broadcast %c0_i32_59 : i32 to vector<2x256xi32>
    %298 = arith.cmpi sge, %296, %297 : vector<2x256xi32>
    %c-1_i32_60 = arith.constant -1 : i32
    %299 = vector.broadcast %c-1_i32_60 : i32 to vector<2x256xi32>
    %300 = arith.addi %4, %299 : vector<2x256xi32>
    %c16_i32_61 = arith.constant 16 : i32
    %301 = vector.broadcast %c16_i32_61 : i32 to vector<2x256xi32>
    %302 = arith.cmpi slt, %300, %301 : vector<2x256xi32>
    %303 = arith.andi %298, %302 : vector<2x256xi1>
    %cst_62 = arith.constant 1.000000e+00 : f32
    %cst_63 = arith.constant 0.000000e+00 : f32
    %304 = vector.broadcast %cst_62 : f32 to vector<2x256xf32>
    %305 = vector.broadcast %cst_63 : f32 to vector<2x256xf32>
    %306 = arith.select %303, %304, %305 : vector<2x256xi1>, vector<2x256xf32>
    %307 = arith.mulf %294, %306 : vector<2x256xf32>
    %308 = arith.addf %169, %307 : vector<2x256xf32>
    %c3 = arith.constant 3 : index
    %309 = memref.load %arg2[%c3] : memref<98xf32, #tpu.memory_space<smem>>
    %c52 = arith.constant 52 : index
    %310 = memref.load %arg2[%c52] : memref<98xf32, #tpu.memory_space<smem>>
    %311 = vector.broadcast %309 : f32 to vector<2x256xf32>
    %312 = arith.mulf %311, %18 : vector<2x256xf32>
    %313 = vector.broadcast %310 : f32 to vector<2x256xf32>
    %314 = arith.mulf %313, %20 : vector<2x256xf32>
    %c10 = arith.constant 10 : index
    %315 = memref.load %arg2[%c10] : memref<98xf32, #tpu.memory_space<smem>>
    %c59 = arith.constant 59 : index
    %316 = memref.load %arg2[%c59] : memref<98xf32, #tpu.memory_space<smem>>
    %317 = vector.broadcast %315 : f32 to vector<2x256xf32>
    %318 = arith.mulf %317, %34 : vector<2x256xf32>
    %319 = vector.broadcast %316 : f32 to vector<2x256xf32>
    %320 = arith.mulf %319, %36 : vector<2x256xf32>
    %321 = arith.addf %312, %318 : vector<2x256xf32>
    %322 = arith.addf %314, %320 : vector<2x256xf32>
    %c17 = arith.constant 17 : index
    %323 = memref.load %arg2[%c17] : memref<98xf32, #tpu.memory_space<smem>>
    %c66 = arith.constant 66 : index
    %324 = memref.load %arg2[%c66] : memref<98xf32, #tpu.memory_space<smem>>
    %325 = vector.broadcast %323 : f32 to vector<2x256xf32>
    %326 = arith.mulf %325, %50 : vector<2x256xf32>
    %327 = vector.broadcast %324 : f32 to vector<2x256xf32>
    %328 = arith.mulf %327, %52 : vector<2x256xf32>
    %329 = arith.addf %321, %326 : vector<2x256xf32>
    %330 = arith.addf %322, %328 : vector<2x256xf32>
    %c24 = arith.constant 24 : index
    %331 = memref.load %arg2[%c24] : memref<98xf32, #tpu.memory_space<smem>>
    %c73 = arith.constant 73 : index
    %332 = memref.load %arg2[%c73] : memref<98xf32, #tpu.memory_space<smem>>
    %333 = vector.broadcast %331 : f32 to vector<2x256xf32>
    %334 = arith.mulf %333, %1 : vector<2x256xf32>
    %335 = vector.broadcast %332 : f32 to vector<2x256xf32>
    %336 = arith.mulf %335, %2 : vector<2x256xf32>
    %337 = arith.addf %329, %334 : vector<2x256xf32>
    %338 = arith.addf %330, %336 : vector<2x256xf32>
    %c31 = arith.constant 31 : index
    %339 = memref.load %arg2[%c31] : memref<98xf32, #tpu.memory_space<smem>>
    %c80 = arith.constant 80 : index
    %340 = memref.load %arg2[%c80] : memref<98xf32, #tpu.memory_space<smem>>
    %341 = vector.broadcast %339 : f32 to vector<2x256xf32>
    %342 = arith.mulf %341, %66 : vector<2x256xf32>
    %343 = vector.broadcast %340 : f32 to vector<2x256xf32>
    %344 = arith.mulf %343, %68 : vector<2x256xf32>
    %345 = arith.addf %337, %342 : vector<2x256xf32>
    %346 = arith.addf %338, %344 : vector<2x256xf32>
    %c38 = arith.constant 38 : index
    %347 = memref.load %arg2[%c38] : memref<98xf32, #tpu.memory_space<smem>>
    %c87 = arith.constant 87 : index
    %348 = memref.load %arg2[%c87] : memref<98xf32, #tpu.memory_space<smem>>
    %349 = vector.broadcast %347 : f32 to vector<2x256xf32>
    %350 = arith.mulf %349, %82 : vector<2x256xf32>
    %351 = vector.broadcast %348 : f32 to vector<2x256xf32>
    %352 = arith.mulf %351, %84 : vector<2x256xf32>
    %353 = arith.addf %345, %350 : vector<2x256xf32>
    %354 = arith.addf %346, %352 : vector<2x256xf32>
    %c45 = arith.constant 45 : index
    %355 = memref.load %arg2[%c45] : memref<98xf32, #tpu.memory_space<smem>>
    %c94 = arith.constant 94 : index
    %356 = memref.load %arg2[%c94] : memref<98xf32, #tpu.memory_space<smem>>
    %357 = vector.broadcast %355 : f32 to vector<2x256xf32>
    %358 = arith.mulf %357, %98 : vector<2x256xf32>
    %359 = vector.broadcast %356 : f32 to vector<2x256xf32>
    %360 = arith.mulf %359, %100 : vector<2x256xf32>
    %361 = arith.addf %353, %358 : vector<2x256xf32>
    %362 = arith.addf %354, %360 : vector<2x256xf32>
    %363 = arith.addf %361, %362 : vector<2x256xf32>
    %364 = arith.addf %238, %363 : vector<2x256xf32>
    %c4 = arith.constant 4 : index
    %365 = memref.load %arg2[%c4] : memref<98xf32, #tpu.memory_space<smem>>
    %c53 = arith.constant 53 : index
    %366 = memref.load %arg2[%c53] : memref<98xf32, #tpu.memory_space<smem>>
    %367 = vector.broadcast %365 : f32 to vector<2x256xf32>
    %368 = arith.mulf %367, %18 : vector<2x256xf32>
    %369 = vector.broadcast %366 : f32 to vector<2x256xf32>
    %370 = arith.mulf %369, %20 : vector<2x256xf32>
    %c11 = arith.constant 11 : index
    %371 = memref.load %arg2[%c11] : memref<98xf32, #tpu.memory_space<smem>>
    %c60 = arith.constant 60 : index
    %372 = memref.load %arg2[%c60] : memref<98xf32, #tpu.memory_space<smem>>
    %373 = vector.broadcast %371 : f32 to vector<2x256xf32>
    %374 = arith.mulf %373, %34 : vector<2x256xf32>
    %375 = vector.broadcast %372 : f32 to vector<2x256xf32>
    %376 = arith.mulf %375, %36 : vector<2x256xf32>
    %377 = arith.addf %368, %374 : vector<2x256xf32>
    %378 = arith.addf %370, %376 : vector<2x256xf32>
    %c18 = arith.constant 18 : index
    %379 = memref.load %arg2[%c18] : memref<98xf32, #tpu.memory_space<smem>>
    %c67 = arith.constant 67 : index
    %380 = memref.load %arg2[%c67] : memref<98xf32, #tpu.memory_space<smem>>
    %381 = vector.broadcast %379 : f32 to vector<2x256xf32>
    %382 = arith.mulf %381, %50 : vector<2x256xf32>
    %383 = vector.broadcast %380 : f32 to vector<2x256xf32>
    %384 = arith.mulf %383, %52 : vector<2x256xf32>
    %385 = arith.addf %377, %382 : vector<2x256xf32>
    %386 = arith.addf %378, %384 : vector<2x256xf32>
    %c25 = arith.constant 25 : index
    %387 = memref.load %arg2[%c25] : memref<98xf32, #tpu.memory_space<smem>>
    %c74 = arith.constant 74 : index
    %388 = memref.load %arg2[%c74] : memref<98xf32, #tpu.memory_space<smem>>
    %389 = vector.broadcast %387 : f32 to vector<2x256xf32>
    %390 = arith.mulf %389, %1 : vector<2x256xf32>
    %391 = vector.broadcast %388 : f32 to vector<2x256xf32>
    %392 = arith.mulf %391, %2 : vector<2x256xf32>
    %393 = arith.addf %385, %390 : vector<2x256xf32>
    %394 = arith.addf %386, %392 : vector<2x256xf32>
    %c32 = arith.constant 32 : index
    %395 = memref.load %arg2[%c32] : memref<98xf32, #tpu.memory_space<smem>>
    %c81 = arith.constant 81 : index
    %396 = memref.load %arg2[%c81] : memref<98xf32, #tpu.memory_space<smem>>
    %397 = vector.broadcast %395 : f32 to vector<2x256xf32>
    %398 = arith.mulf %397, %66 : vector<2x256xf32>
    %399 = vector.broadcast %396 : f32 to vector<2x256xf32>
    %400 = arith.mulf %399, %68 : vector<2x256xf32>
    %401 = arith.addf %393, %398 : vector<2x256xf32>
    %402 = arith.addf %394, %400 : vector<2x256xf32>
    %c39 = arith.constant 39 : index
    %403 = memref.load %arg2[%c39] : memref<98xf32, #tpu.memory_space<smem>>
    %c88 = arith.constant 88 : index
    %404 = memref.load %arg2[%c88] : memref<98xf32, #tpu.memory_space<smem>>
    %405 = vector.broadcast %403 : f32 to vector<2x256xf32>
    %406 = arith.mulf %405, %82 : vector<2x256xf32>
    %407 = vector.broadcast %404 : f32 to vector<2x256xf32>
    %408 = arith.mulf %407, %84 : vector<2x256xf32>
    %409 = arith.addf %401, %406 : vector<2x256xf32>
    %410 = arith.addf %402, %408 : vector<2x256xf32>
    %c46 = arith.constant 46 : index
    %411 = memref.load %arg2[%c46] : memref<98xf32, #tpu.memory_space<smem>>
    %c95 = arith.constant 95 : index
    %412 = memref.load %arg2[%c95] : memref<98xf32, #tpu.memory_space<smem>>
    %413 = vector.broadcast %411 : f32 to vector<2x256xf32>
    %414 = arith.mulf %413, %98 : vector<2x256xf32>
    %415 = vector.broadcast %412 : f32 to vector<2x256xf32>
    %416 = arith.mulf %415, %100 : vector<2x256xf32>
    %417 = arith.addf %409, %414 : vector<2x256xf32>
    %418 = arith.addf %410, %416 : vector<2x256xf32>
    %419 = arith.addf %417, %418 : vector<2x256xf32>
    %c255_i32 = arith.constant 255 : i32
    %420 = tpu.dynamic_rotate %419 by %c255_i32 dim 1 : vector<2x256xf32>, i32 -> vector<2x256xf32>
    %c1_i32_64 = arith.constant 1 : i32
    %421 = vector.broadcast %c1_i32_64 : i32 to vector<2x256xi32>
    %422 = arith.addi %4, %421 : vector<2x256xi32>
    %c0_i32_65 = arith.constant 0 : i32
    %423 = vector.broadcast %c0_i32_65 : i32 to vector<2x256xi32>
    %424 = arith.cmpi sge, %422, %423 : vector<2x256xi32>
    %c1_i32_66 = arith.constant 1 : i32
    %425 = vector.broadcast %c1_i32_66 : i32 to vector<2x256xi32>
    %426 = arith.addi %4, %425 : vector<2x256xi32>
    %c16_i32_67 = arith.constant 16 : i32
    %427 = vector.broadcast %c16_i32_67 : i32 to vector<2x256xi32>
    %428 = arith.cmpi slt, %426, %427 : vector<2x256xi32>
    %429 = arith.andi %424, %428 : vector<2x256xi1>
    %cst_68 = arith.constant 1.000000e+00 : f32
    %cst_69 = arith.constant 0.000000e+00 : f32
    %430 = vector.broadcast %cst_68 : f32 to vector<2x256xf32>
    %431 = vector.broadcast %cst_69 : f32 to vector<2x256xf32>
    %432 = arith.select %429, %430, %431 : vector<2x256xi1>, vector<2x256xf32>
    %433 = arith.mulf %420, %432 : vector<2x256xf32>
    %434 = arith.addf %308, %433 : vector<2x256xf32>
    %c5 = arith.constant 5 : index
    %435 = memref.load %arg2[%c5] : memref<98xf32, #tpu.memory_space<smem>>
    %c54 = arith.constant 54 : index
    %436 = memref.load %arg2[%c54] : memref<98xf32, #tpu.memory_space<smem>>
    %437 = vector.broadcast %435 : f32 to vector<2x256xf32>
    %438 = arith.mulf %437, %18 : vector<2x256xf32>
    %439 = vector.broadcast %436 : f32 to vector<2x256xf32>
    %440 = arith.mulf %439, %20 : vector<2x256xf32>
    %c12 = arith.constant 12 : index
    %441 = memref.load %arg2[%c12] : memref<98xf32, #tpu.memory_space<smem>>
    %c61 = arith.constant 61 : index
    %442 = memref.load %arg2[%c61] : memref<98xf32, #tpu.memory_space<smem>>
    %443 = vector.broadcast %441 : f32 to vector<2x256xf32>
    %444 = arith.mulf %443, %34 : vector<2x256xf32>
    %445 = vector.broadcast %442 : f32 to vector<2x256xf32>
    %446 = arith.mulf %445, %36 : vector<2x256xf32>
    %447 = arith.addf %438, %444 : vector<2x256xf32>
    %448 = arith.addf %440, %446 : vector<2x256xf32>
    %c19 = arith.constant 19 : index
    %449 = memref.load %arg2[%c19] : memref<98xf32, #tpu.memory_space<smem>>
    %c68 = arith.constant 68 : index
    %450 = memref.load %arg2[%c68] : memref<98xf32, #tpu.memory_space<smem>>
    %451 = vector.broadcast %449 : f32 to vector<2x256xf32>
    %452 = arith.mulf %451, %50 : vector<2x256xf32>
    %453 = vector.broadcast %450 : f32 to vector<2x256xf32>
    %454 = arith.mulf %453, %52 : vector<2x256xf32>
    %455 = arith.addf %447, %452 : vector<2x256xf32>
    %456 = arith.addf %448, %454 : vector<2x256xf32>
    %c26 = arith.constant 26 : index
    %457 = memref.load %arg2[%c26] : memref<98xf32, #tpu.memory_space<smem>>
    %c75 = arith.constant 75 : index
    %458 = memref.load %arg2[%c75] : memref<98xf32, #tpu.memory_space<smem>>
    %459 = vector.broadcast %457 : f32 to vector<2x256xf32>
    %460 = arith.mulf %459, %1 : vector<2x256xf32>
    %461 = vector.broadcast %458 : f32 to vector<2x256xf32>
    %462 = arith.mulf %461, %2 : vector<2x256xf32>
    %463 = arith.addf %455, %460 : vector<2x256xf32>
    %464 = arith.addf %456, %462 : vector<2x256xf32>
    %c33 = arith.constant 33 : index
    %465 = memref.load %arg2[%c33] : memref<98xf32, #tpu.memory_space<smem>>
    %c82 = arith.constant 82 : index
    %466 = memref.load %arg2[%c82] : memref<98xf32, #tpu.memory_space<smem>>
    %467 = vector.broadcast %465 : f32 to vector<2x256xf32>
    %468 = arith.mulf %467, %66 : vector<2x256xf32>
    %469 = vector.broadcast %466 : f32 to vector<2x256xf32>
    %470 = arith.mulf %469, %68 : vector<2x256xf32>
    %471 = arith.addf %463, %468 : vector<2x256xf32>
    %472 = arith.addf %464, %470 : vector<2x256xf32>
    %c40 = arith.constant 40 : index
    %473 = memref.load %arg2[%c40] : memref<98xf32, #tpu.memory_space<smem>>
    %c89 = arith.constant 89 : index
    %474 = memref.load %arg2[%c89] : memref<98xf32, #tpu.memory_space<smem>>
    %475 = vector.broadcast %473 : f32 to vector<2x256xf32>
    %476 = arith.mulf %475, %82 : vector<2x256xf32>
    %477 = vector.broadcast %474 : f32 to vector<2x256xf32>
    %478 = arith.mulf %477, %84 : vector<2x256xf32>
    %479 = arith.addf %471, %476 : vector<2x256xf32>
    %480 = arith.addf %472, %478 : vector<2x256xf32>
    %c47 = arith.constant 47 : index
    %481 = memref.load %arg2[%c47] : memref<98xf32, #tpu.memory_space<smem>>
    %c96 = arith.constant 96 : index
    %482 = memref.load %arg2[%c96] : memref<98xf32, #tpu.memory_space<smem>>
    %483 = vector.broadcast %481 : f32 to vector<2x256xf32>
    %484 = arith.mulf %483, %98 : vector<2x256xf32>
    %485 = vector.broadcast %482 : f32 to vector<2x256xf32>
    %486 = arith.mulf %485, %100 : vector<2x256xf32>
    %487 = arith.addf %479, %484 : vector<2x256xf32>
    %488 = arith.addf %480, %486 : vector<2x256xf32>
    %489 = arith.addf %487, %488 : vector<2x256xf32>
    %c254_i32 = arith.constant 254 : i32
    %490 = tpu.dynamic_rotate %489 by %c254_i32 dim 1 : vector<2x256xf32>, i32 -> vector<2x256xf32>
    %c2_i32_70 = arith.constant 2 : i32
    %491 = vector.broadcast %c2_i32_70 : i32 to vector<2x256xi32>
    %492 = arith.addi %4, %491 : vector<2x256xi32>
    %c0_i32_71 = arith.constant 0 : i32
    %493 = vector.broadcast %c0_i32_71 : i32 to vector<2x256xi32>
    %494 = arith.cmpi sge, %492, %493 : vector<2x256xi32>
    %c2_i32_72 = arith.constant 2 : i32
    %495 = vector.broadcast %c2_i32_72 : i32 to vector<2x256xi32>
    %496 = arith.addi %4, %495 : vector<2x256xi32>
    %c16_i32_73 = arith.constant 16 : i32
    %497 = vector.broadcast %c16_i32_73 : i32 to vector<2x256xi32>
    %498 = arith.cmpi slt, %496, %497 : vector<2x256xi32>
    %499 = arith.andi %494, %498 : vector<2x256xi1>
    %cst_74 = arith.constant 1.000000e+00 : f32
    %cst_75 = arith.constant 0.000000e+00 : f32
    %500 = vector.broadcast %cst_74 : f32 to vector<2x256xf32>
    %501 = vector.broadcast %cst_75 : f32 to vector<2x256xf32>
    %502 = arith.select %499, %500, %501 : vector<2x256xi1>, vector<2x256xf32>
    %503 = arith.mulf %490, %502 : vector<2x256xf32>
    %504 = arith.addf %364, %503 : vector<2x256xf32>
    %c6 = arith.constant 6 : index
    %505 = memref.load %arg2[%c6] : memref<98xf32, #tpu.memory_space<smem>>
    %c55 = arith.constant 55 : index
    %506 = memref.load %arg2[%c55] : memref<98xf32, #tpu.memory_space<smem>>
    %507 = vector.broadcast %505 : f32 to vector<2x256xf32>
    %508 = arith.mulf %507, %18 : vector<2x256xf32>
    %509 = vector.broadcast %506 : f32 to vector<2x256xf32>
    %510 = arith.mulf %509, %20 : vector<2x256xf32>
    %c13 = arith.constant 13 : index
    %511 = memref.load %arg2[%c13] : memref<98xf32, #tpu.memory_space<smem>>
    %c62 = arith.constant 62 : index
    %512 = memref.load %arg2[%c62] : memref<98xf32, #tpu.memory_space<smem>>
    %513 = vector.broadcast %511 : f32 to vector<2x256xf32>
    %514 = arith.mulf %513, %34 : vector<2x256xf32>
    %515 = vector.broadcast %512 : f32 to vector<2x256xf32>
    %516 = arith.mulf %515, %36 : vector<2x256xf32>
    %517 = arith.addf %508, %514 : vector<2x256xf32>
    %518 = arith.addf %510, %516 : vector<2x256xf32>
    %c20 = arith.constant 20 : index
    %519 = memref.load %arg2[%c20] : memref<98xf32, #tpu.memory_space<smem>>
    %c69 = arith.constant 69 : index
    %520 = memref.load %arg2[%c69] : memref<98xf32, #tpu.memory_space<smem>>
    %521 = vector.broadcast %519 : f32 to vector<2x256xf32>
    %522 = arith.mulf %521, %50 : vector<2x256xf32>
    %523 = vector.broadcast %520 : f32 to vector<2x256xf32>
    %524 = arith.mulf %523, %52 : vector<2x256xf32>
    %525 = arith.addf %517, %522 : vector<2x256xf32>
    %526 = arith.addf %518, %524 : vector<2x256xf32>
    %c27 = arith.constant 27 : index
    %527 = memref.load %arg2[%c27] : memref<98xf32, #tpu.memory_space<smem>>
    %c76 = arith.constant 76 : index
    %528 = memref.load %arg2[%c76] : memref<98xf32, #tpu.memory_space<smem>>
    %529 = vector.broadcast %527 : f32 to vector<2x256xf32>
    %530 = arith.mulf %529, %1 : vector<2x256xf32>
    %531 = vector.broadcast %528 : f32 to vector<2x256xf32>
    %532 = arith.mulf %531, %2 : vector<2x256xf32>
    %533 = arith.addf %525, %530 : vector<2x256xf32>
    %534 = arith.addf %526, %532 : vector<2x256xf32>
    %c34 = arith.constant 34 : index
    %535 = memref.load %arg2[%c34] : memref<98xf32, #tpu.memory_space<smem>>
    %c83 = arith.constant 83 : index
    %536 = memref.load %arg2[%c83] : memref<98xf32, #tpu.memory_space<smem>>
    %537 = vector.broadcast %535 : f32 to vector<2x256xf32>
    %538 = arith.mulf %537, %66 : vector<2x256xf32>
    %539 = vector.broadcast %536 : f32 to vector<2x256xf32>
    %540 = arith.mulf %539, %68 : vector<2x256xf32>
    %541 = arith.addf %533, %538 : vector<2x256xf32>
    %542 = arith.addf %534, %540 : vector<2x256xf32>
    %c41 = arith.constant 41 : index
    %543 = memref.load %arg2[%c41] : memref<98xf32, #tpu.memory_space<smem>>
    %c90 = arith.constant 90 : index
    %544 = memref.load %arg2[%c90] : memref<98xf32, #tpu.memory_space<smem>>
    %545 = vector.broadcast %543 : f32 to vector<2x256xf32>
    %546 = arith.mulf %545, %82 : vector<2x256xf32>
    %547 = vector.broadcast %544 : f32 to vector<2x256xf32>
    %548 = arith.mulf %547, %84 : vector<2x256xf32>
    %549 = arith.addf %541, %546 : vector<2x256xf32>
    %550 = arith.addf %542, %548 : vector<2x256xf32>
    %c48 = arith.constant 48 : index
    %551 = memref.load %arg2[%c48] : memref<98xf32, #tpu.memory_space<smem>>
    %c97 = arith.constant 97 : index
    %552 = memref.load %arg2[%c97] : memref<98xf32, #tpu.memory_space<smem>>
    %553 = vector.broadcast %551 : f32 to vector<2x256xf32>
    %554 = arith.mulf %553, %98 : vector<2x256xf32>
    %555 = vector.broadcast %552 : f32 to vector<2x256xf32>
    %556 = arith.mulf %555, %100 : vector<2x256xf32>
    %557 = arith.addf %549, %554 : vector<2x256xf32>
    %558 = arith.addf %550, %556 : vector<2x256xf32>
    %559 = arith.addf %557, %558 : vector<2x256xf32>
    %c253_i32 = arith.constant 253 : i32
    %560 = tpu.dynamic_rotate %559 by %c253_i32 dim 1 : vector<2x256xf32>, i32 -> vector<2x256xf32>
    %c3_i32_76 = arith.constant 3 : i32
    %561 = vector.broadcast %c3_i32_76 : i32 to vector<2x256xi32>
    %562 = arith.addi %4, %561 : vector<2x256xi32>
    %c0_i32_77 = arith.constant 0 : i32
    %563 = vector.broadcast %c0_i32_77 : i32 to vector<2x256xi32>
    %564 = arith.cmpi sge, %562, %563 : vector<2x256xi32>
    %c3_i32_78 = arith.constant 3 : i32
    %565 = vector.broadcast %c3_i32_78 : i32 to vector<2x256xi32>
    %566 = arith.addi %4, %565 : vector<2x256xi32>
    %c16_i32_79 = arith.constant 16 : i32
    %567 = vector.broadcast %c16_i32_79 : i32 to vector<2x256xi32>
    %568 = arith.cmpi slt, %566, %567 : vector<2x256xi32>
    %569 = arith.andi %564, %568 : vector<2x256xi1>
    %cst_80 = arith.constant 1.000000e+00 : f32
    %cst_81 = arith.constant 0.000000e+00 : f32
    %570 = vector.broadcast %cst_80 : f32 to vector<2x256xf32>
    %571 = vector.broadcast %cst_81 : f32 to vector<2x256xf32>
    %572 = arith.select %569, %570, %571 : vector<2x256xi1>, vector<2x256xf32>
    %573 = arith.mulf %560, %572 : vector<2x256xf32>
    %574 = arith.addf %434, %573 : vector<2x256xf32>
    %575 = arith.addf %574, %504 : vector<2x256xf32>
    %576 = arith.negf %575 : vector<2x256xf32>
    %577 = math.exp %576 : vector<2x256xf32>
    %cst_82 = arith.constant 1.000000e+00 : f32
    %578 = vector.broadcast %cst_82 : f32 to vector<2x256xf32>
    %579 = arith.addf %578, %577 : vector<2x256xf32>
    %580 = arith.divf %578, %579 : vector<2x256xf32>
    %c0_83 = arith.constant 0 : index
    %c0_84 = arith.constant 0 : index
    %581 = vector.load %arg5[%c0_83, %c0_84] : memref<2x256xf32, #tpu.memory_space<vmem>>, vector<2x256xf32>
    tpu.vector_store %arg5[%c0_83, %c0_84], %580 {strides = array<i32>} : memref<2x256xf32, #tpu.memory_space<vmem>>, vector<2x256xf32>,
    return
  }
  func.func @transform_0(%arg0: i32) -> (i32, i32, i32) {
    %c0_i32 = arith.constant 0 : i32
    %c0_i32_0 = arith.constant 0 : i32
    %c0_i32_1 = arith.constant 0 : i32
    %c0_i32_2 = arith.constant 0 : i32
    return %c0_i32, %c0_i32_0, %c0_i32_1 : i32, i32, i32
  }
  func.func @transform_1(%arg0: i32) -> i32 {
    %c0_i32 = arith.constant 0 : i32
    %c0_i32_0 = arith.constant 0 : i32
    return %c0_i32 : i32
  }
  func.func @transform_2(%arg0: i32) -> (i32, i32) {
    %c0_i32 = arith.constant 0 : i32
    %c0_i32_0 = arith.constant 0 : i32
    %c0_i32_1 = arith.constant 0 : i32
    return %c0_i32, %c0_i32_0 : i32, i32
  }
  func.func @transform_3(%arg0: i32) -> (i32, i32) {
    %c0_i32 = arith.constant 0 : i32
    %c0_i32_0 = arith.constant 0 : i32
    %c0_i32_1 = arith.constant 0 : i32
    return %c0_i32, %c0_i32_0 : i32, i32
  }
  func.func @transform_4(%arg0: i32) -> (i32, i32) {
    %c0_i32 = arith.constant 0 : i32
    %c0_i32_0 = arith.constant 0 : i32
    %c0_i32_1 = arith.constant 0 : i32
    return %c0_i32, %c0_i32_0 : i32, i32
  }
}

</mosaic_0001>

<bundles_post_ra>
// kernel: tpu_custom_call.1
= control target key start
LH: loop header
LB: loop body
LE: loop exit
PB: predicated region body
PF: predicated region fallthrough
CT: control target
= control target key end

     0   :  { %s2648_s0 = inlined_call_operand.hbm [shape: f32[4,2,256], index: 0, kind: input, shape index: {}]   ;;  %s2649_s1 = inlined_call_operand.hbm [shape: f32[98], index: 1, kind: input, shape index: {}]   ;;  %s2650_s2 = inlined_call_operand.hbm [shape: s32[2,256], index: 2, kind: input, shape index: {}]   ;;  %s2651_s3 = inlined_call_operand.hbm [shape: s32[2,256], index: 3, kind: input, shape index: {}]   ;;  %s2652_s4 = inlined_call_operand.hbm [shape: f32[2,256], index: 4, kind: output, shape index: {}]  }
   0x1   :  { %2690 = sst [smem:[#allocation49_spill]] %s2652_s4 }
   0x2   :  { %9 = vsyncpa [#allocation3], 0 }
   0x3   :  { %10 = vsyncpa [#allocation5], 0 }
   0x4   :  { %11 = vsyncpa [#allocation8], 0  ;;  %s40_s17 = sshll.u32 %s2650_s2, 4  ;;  %s41_s17 = int_to_ptr.hbm [resolvable:$true] %s40_s17 }
   0x5   :  { %12 = vsyncpa [#allocation4], 0  ;;  %s1407_s18 = smov [#allocation7]   ;;  %s17_s22 = sshll.u32 %s2648_s0, 4  ;;  %s18_s22 = int_to_ptr.hbm [resolvable:$true] %s17_s22 }
   0x6   :  { %s42_s19 = sshll.u32 %s1407_s18, 4  ;;  %s1408_s23 = smov [#allocation2]   ;;  %s43_s19 = int_to_ptr.vmem [resolvable:$true] %s42_s19 }
   0x7   :  { %45 = dma.hbm_to_vmem [thread:$0]  %s41_s17, 64, %s43_s19, [#allocation8]  }
   0x8   :  { %s19_s24 = sshll.u32 %s1408_s23, 4  ;;  %s1409_s25 = smov 64   ;;  %s20_s24 = int_to_ptr.vmem [resolvable:$true] %s19_s24 }
   0x9   :  { %s1410_s26 = smov 4   ;;  %s31_s2 = sshll.u32 %s2649_s1, 4  ;;  %s32_s2 = int_to_ptr.hbm [resolvable:$true] %s31_s2 }
   0xa   :  { %25 = dma.hbm_to_vmem [thread:$0]  %s18_s22, 256, %s20_s24, [#allocation3], %s1409_s25, %s1409_s25, %s1410_s26  }
   0xb   :  { %s51_s5 = sshll.u32 %s2651_s3, 4  ;;  %s1411_s6 = smov [#allocation6]   ;;  %s52_s5 = int_to_ptr.hbm [resolvable:$true] %s51_s5 }
   0xc   :  { %34 = dma.hbm_to_smem %s32_s2, 16, %s1411_s6, [#allocation5]  }
   0xd   :  { %s1412_s0 = smov [#allocation9]  }
   0xe   :  { %s53_s7 = sshll.u32 %s1412_s0, 4  ;;  %s54_s7 = int_to_ptr.vmem [resolvable:$true] %s53_s7 }
   0xf   :  { %56 = dma.hbm_to_vmem [thread:$0]  %s52_s5, 64, %s54_s7, [#allocation8]  }
  0x10   :  { %1399 = dma.done.wait [#allocation3], 256  }
  0x11   :  { %1400 = vsyncadd [#allocation3], 4294967040 }
  0x12   :  { %1401 = dma.done.wait [#allocation5], 16  }
  0x13   :  { %1402 = vsyncadd [#allocation5], 4294967280 }
  0x14   :  { %1403 = dma.done.wait [#allocation8], 128  }
  0x15   :  { %1404 = vsyncadd [#allocation8], 4294967168 }
  0x16   :  { %73 = sfence }
  0x17   :  { %v74_v0 = vld [vmem:[#allocation2] sm:$0xf]  ;;  %v75_v1 = vld [vmem:[#allocation2 + $0x4] sm:$0xf]  ;;  %v1464_v2 = vld [vmem:[#allocation7] sm:$0xf] }
  0x18   :  { %82 = vst [vmem:[#allocation1] ss:$4 sm:$0xff] %v74_v0  ;;  %v129_v3 = vadd.s32 4294967293, %v1464_v2  ;;  %v76_v4 = vld [vmem:[#allocation2 + $0x8] sm:$0xf]  ;;  %vm103_vm0 = vcmask 1041408  }
  0x19   :  { %86 = vst [vmem:[#allocation1 + $0x20] ss:$4 sm:$0xff] %v75_v1  ;;  %vm118_vm1 = vcmask 1043458   ;;  %v77_v9 = vld [vmem:[#allocation2 + $0xc] sm:$0xf]  ;;  %v2655_v17 = vmov 0.0  }
  0x1a   :  { %vm130_vm2 = vcmp.ge.s32.totalorder %v129_v3, 0  ;;  %vm131_vm3 = vcmp.lt.s32.totalorder %v129_v3, 16  ;;  %vm119_vm4 = vmor %vm118_vm1, %vm103_vm0  ;;  %v246_v27 = vadd.s32 1, %v1464_v2  ;;  %v284_v28 = vadd.s32 2, %v1464_v2  ;;  %s1414_s1 = smov 48   ;;  %s1415_s3 = smov 32  }
  0x1b   :  { %vm132_vm5 = vmand %vm130_vm2, %vm131_vm3  ;;  %v120_v12 = vsel %vm119_vm4, %v74_v0, -inf  ;;  %v121_v13 = vsel %vm119_vm4, %v75_v1, -inf  ;;  %v122_v14 = vsel %vm119_vm4, %v76_v4, -inf  ;;  %v123_v15 = vsel %vm119_vm4, %v77_v9, -inf  ;;  %v1498_v37 = vld [vmem:[#allocation9] sm:$0xf] }
  0x1c   :  { %v133_v18 = vsel %vm132_vm5, 1.0, %v2655_v17  ;;  %v124_v21 = vmax.f32 %v120_v12, %v121_v13  ;;  %v125_v22 = vmax.f32 %v122_v14, %v123_v15  ;;  %v322_v29 = vadd.s32 3, %v1464_v2  ;;  %s1416_s8 = smov 112   ;;  %s1417_s9 = smov 96  }
  0x1d   :  { %vm247_vm6 = vcmp.ge.s32.totalorder %v246_v27, 0  ;;  %vm248_vm7 = vcmp.lt.s32.totalorder %v246_v27, 16  ;;  %vm285_vm8 = vcmp.ge.s32.totalorder %v284_v28, 0  ;;  %vm286_vm9 = vcmp.lt.s32.totalorder %v284_v28, 16  ;;  %s1418_s10 = smov 16   ;;  %s1419_s11 = smov 80  }
  0x1e   :  { %v1478_v31 = vmax.f32 %v124_v21, %v125_v22  ;;  %vm323_vm10 = vcmp.ge.s32.totalorder %v322_v29, 0  ;;  %vm249_vm11 = vmand %vm247_vm6, %vm248_vm7  ;;  %vm324_vm12 = vcmp.lt.s32.totalorder %v322_v29, 16  ;;  %v170_v38 = vadd.s32 4294967294, %v1464_v2  ;;  %s1170_s12 = sld [smem:[#allocation6 + $0x46]] }
  0x1f   :  { %v83_v5 = vld.sshfl [vmem:[#allocation1] sm:$0xff pattern:$0x73625140]  ;;  %v84_v6 = vld.sshfl [vmem:[#allocation1 + $0x8] sm:$0xff pattern:$0x73625140]  ;;  %vm287_vm13 = vmand %vm285_vm8, %vm286_vm9 }
  0x20   :  { %v87_v7 = vld.sshfl [vmem:[#allocation1 + $0x20] sm:$0xff pattern:$0x73625140]  ;;  %v88_v8 = vld.sshfl [vmem:[#allocation1 + $0x28] sm:$0xff pattern:$0x73625140]  ;;  %vm325_vm14 = vmand %vm323_vm10, %vm324_vm12 }
  0x21   :  { %89 = vst [vmem:[#allocation1] ss:$4 sm:$0xff] %v76_v4  ;;  %v104_v10 = vsel %vm103_vm0, %v83_v5, 0.0  ;;  %v105_v11 = vsel %vm103_vm0, %v87_v7, 0.0  ;;  %v1485_v32 = vsel %vm249_vm11, 1.0, %v2655_v17  ;;  %v1493_v35 = vsel %vm287_vm13, 1.0, %v2655_v17 }
  0x22   :  { %92 = vst [vmem:[#allocation1 + $0x20] ss:$4 sm:$0xff] %v77_v9  ;;  %v106_v16 = vadd.f32 %v105_v11, %v104_v10  ;;  %v1496_v36 = vsel %vm325_vm14, 1.0, %v2655_v17  ;;  %v975_v39 = vadd.s32 2, %v1498_v37  ;;  %v1084_v40 = vadd.s32 3, %v1498_v37  ;;  %s1184_s13 = sld [smem:[#allocation6 + $0x47]] }
  0x23   :  { %v111_v42 = vsel %vm103_vm0, %v84_v6, 0.0  ;;  %vm171_vm4 = vcmp.ge.s32.totalorder %v170_v38, 0  ;;  %vm172_vm5 = vcmp.lt.s32.totalorder %v170_v38, 16  ;;  %v112_v43 = vsel %vm103_vm0, %v88_v8, 0.0  ;;  %s1609_s14 = sld [smem:[#allocation6 + $0x48]] }
  0x24   :  { %vm976_vm15 = vcmp.ge.s32.totalorder %v975_v39, 0  ;;  %vm977_vm1 = vcmp.lt.s32.totalorder %v975_v39, 16  ;;  %vm1085_vm2 = vcmp.ge.s32.totalorder %v1084_v40, 0  ;;  %vm1086_vm3 = vcmp.lt.s32.totalorder %v1084_v40, 16  ;;  %vm173_vm8 = vmand %vm171_vm4, %vm172_vm5  ;;  %s1611_s15 = sld [smem:[#allocation6 + $0x49]] }
  0x25   :  { %vm978_vm6 = vmand %vm976_vm15, %vm977_vm1  ;;  %v113_v47 = vadd.f32 %v112_v43, %v111_v42  ;;  %v174_v53 = vsel %vm173_vm8, 1.0, %v2655_v17  ;;  %v208_v58 = vadd.s32 4294967295, %v1464_v2  ;;  %s1613_s16 = sld [smem:[#allocation6 + $0x4a]] }
  0x26   :  { %vm1087_vm7 = vmand %vm1085_vm2, %vm1086_vm3  ;;  %v1507_v48 = vsel %vm978_vm6, 1.0, %v2655_v17  ;;  %s1617_s17 = sld [smem:[#allocation6 + $0x4b]] }
  0x27   :  { %2692 = vst [vmem:[#allocation16_spill] sm:$0xff] %v1507_v48  ;;  %v1510_v49 = vsel %vm1087_vm7, 1.0, %v2655_v17  ;;  %vm209_vm9 = vcmp.ge.s32.totalorder %v208_v58, 0  ;;  %vm210_vm10 = vcmp.lt.s32.totalorder %v208_v58, 16  ;;  %s1619_s18 = sld [smem:[#allocation6 + $0x4c]] }
  0x28   :  { %v90_v19 = vld.sshfl [vmem:[#allocation1] sm:$0xff pattern:$0x73625140]  ;;  %v91_v20 = vld.sshfl [vmem:[#allocation1 + $0x8] sm:$0xff pattern:$0x73625140]  ;;  %vm211_vm11 = vmand %vm209_vm9, %vm210_vm10 }
  0x29   :  { %v93_v23 = vld.sshfl [vmem:[#allocation1 + $0x20] sm:$0xff pattern:$0x73625140]  ;;  %v107_v24 = vsel %vm103_vm0, %v90_v19, 0.0  ;;  %144 = vst [vmem:[#allocation1] ss:$4 sm:$0xff] %v133_v18 }
  0x2a   :  { %v108_v25 = vadd.f32 %v107_v24, %v106_v16  ;;  %v109_v26 = vsel %vm103_vm0, %v93_v23, 0.0  ;;  %v94_v41 = vld.sshfl [vmem:[#allocation1 + $0x28] sm:$0xff pattern:$0x73625140]  ;;  %v114_v44 = vsel %vm103_vm0, %v91_v20, 0.0  ;;  %2693 = vst [vmem:[#allocation17_spill] sm:$0xff] %v1510_v49 }
  0x2b   :  { %v116_v50 = vsel %vm103_vm0, %v94_v41, 0.0  ;;  %v115_v51 = vadd.f32 %v114_v44, %v113_v47  ;;  %v212_v61 = vsel %vm211_vm11, 1.0, %v2655_v17  ;;  %s1622_s19 = sld [smem:[#allocation6]]  ;;  %v504_v44 = vstv %s1184_s13 }
  0x2c   :  { %v1476_v30 = vadd.f32 %v109_v26, %v108_v25  ;;  %v397_v25 = vstv %s1170_s12  ;;  %v454_v26 = vadd.s32 4294967293, %v1498_v37  ;;  %s1626_s20 = sld [smem:[#allocation6 + $0x7]] }
  0x2d   :  { %v1513_v52 = vadd.f32 %v116_v50, %v115_v51  ;;  %v398_v28 = vmul.f32 %v397_v25, %v1478_v31  ;;  %s1632_s21 = sld [smem:[#allocation6 + $0xe]] }
  0x2e   :  { %2691 = vst [vmem:[#allocation15_spill] sm:$0xff] %v1476_v30  ;;  %134 = vrot.lane.b32.xlu0 %v1476_v30, %s1414_s1  ;;  %175 = vrot.lane.b32.xlu2 %v1476_v30, %s1415_s3  ;;  %vm455_vm12 = vcmp.ge.s32.totalorder %v454_v26, 0  ;;  %vm456_vm13 = vcmp.lt.s32.totalorder %v454_v26, 16  ;;  %s1635_s22 = sld [smem:[#allocation6 + $0x2]] }
  0x2f   :  { %2694 = vst [vmem:[#allocation18_spill] sm:$0xff] %v1513_v52  ;;  %253 = vrot.lane.b32.xlu1 %v1513_v52, %s1416_s8  ;;  %vm457_vm14 = vmand %vm455_vm12, %vm456_vm13  ;;  %s1637_s23 = sld [smem:[#allocation6 + $0x15]] }
  0x30   :  { %v1487_v33 = vld.sshfl [vmem:[#allocation1] sm:$0xff pattern:$0x73625140]  ;;  %v1489_v34 = vld.sshfl [vmem:[#allocation1 + $0x8] sm:$0xff pattern:$0x73625140] }
  0x31   :  { %152 = vst [vmem:[#allocation1] ss:$4 sm:$0xff] %v1478_v31  ;;  %v458_v40 = vsel %vm457_vm14, 1.0, %v2655_v17  ;;  %s1640_s24 = sld [smem:[#allocation6 + $0x9]] }
  0x32   :  { %s1646_s25 = sld [smem:[#allocation6 + $0x1c]] }
  0x33   :  { %s1648_s26 = sld [smem:[#allocation6 + $0x23]] }
  0x34   :  { %s1655_s27 = sld [smem:[#allocation6 + $0x10]] }
  0x35   :  { %s1665_s28 = sld [smem:[#allocation6 + $0x17]] }
  0x36   :  { %136 = vrot.lane.b32.xlu0 %v1513_v52, %s1414_s1  ;;  %177 = vrot.lane.b32.xlu2 %v1513_v52, %s1415_s3  ;;  %s1673_s2 = sld [smem:[#allocation6 + $0x1e]] }
  0x37   :  { %289 = vrot.lane.b32.xlu1 %v1476_v30, %s1417_s9  ;;  %s1687_s29 = sld [smem:[#allocation6 + $0x25]] }
  0x38   :  { %v153_v45 = vld.sshfl [vmem:[#allocation1] sm:$0xff pattern:$0x73625140]  ;;  %v154_v46 = vld.sshfl [vmem:[#allocation1 + $0x8] sm:$0xff pattern:$0x73625140] }
  0x39   :  { %163 = vst [vmem:[#allocation1] ss:$4 sm:$0xff] %v133_v18  ;;  %s1693_s30 = sld [smem:[#allocation6 + $0x1]] }
  0x3a   :  { %s1696_s5 = sld [smem:[#allocation6 + $0x8]] }
  0x3b   :  { %s1706_s6 = sld [smem:[#allocation6 + $0xf]] }
  0x3c   :  { %s1718_s0 = sld [smem:[#allocation6 + $0x16]] }
  0x3d   :  { %s1732_s7 = sld [smem:[#allocation6 + $0x1d]] }
  0x3e   :  { %215 = vrot.lane.b32.xlu0 %v1513_v52, %s1418_s10  ;;  %213 = vrot.lane.b32.xlu2 %v1476_v30, %s1418_s10  ;;  %s1794_s12 = sld [smem:[#allocation6 + $0x33]] }
  0x3f   :  { %157 = vrot.lane.b32.xlu1 %v153_v45, %s1414_s1  ;;  %v561_v45 = vadd.s32 4294967294, %v1498_v37  ;;  %s1803_s13 = sld [smem:[#allocation6 + $0x3a]] }
  0x40   :  { %v1522_v54 = vld.sshfl [vmem:[#allocation1] sm:$0xff pattern:$0x73625140]  ;;  %v1524_v55 = vld.sshfl [vmem:[#allocation1 + $0x8] sm:$0xff pattern:$0x73625140] }
  0x41   :  { %183 = vst [vmem:[#allocation1] ss:$4 sm:$0xff] %v174_v53  ;;  %vm562_vm2 = vcmp.ge.s32.totalorder %v561_v45, 0  ;;  %vm563_vm3 = vcmp.lt.s32.totalorder %v561_v45, 16  ;;  %s2113_s4 = sld [smem:[#allocation6 + $0x51]] }
  0x42   :  { %vm564_vm5 = vmand %vm562_vm2, %vm563_vm3 }
  0x46   :  { %251 = vrot.lane.b32.xlu0 %v1476_v30, %s1416_s8  ;;  %291 = vrot.lane.b32.xlu2 %v1513_v52, %s1417_s9 }
  0x47   :  { %159 = vrot.lane.b32.xlu1 %v154_v46, %s1414_s1  ;;  %v505_v46 = vmul.f32 %v504_v44, %v1478_v31  ;;  %v382_v44 = vstv %s1632_s21  ;;  %s1742_s1 = sld [smem:[#allocation6 + $0x24]] }
  0x48   :  { %v1532_v56 = vld.sshfl [vmem:[#allocation1] sm:$0xff pattern:$0x73625140]  ;;  %v1534_v57 = vld.sshfl [vmem:[#allocation1 + $0x8] sm:$0xff pattern:$0x73625140] }
  0x49   :  { %190 = vst [vmem:[#allocation1] ss:$4 sm:$0xff] %v1478_v31  ;;  %s1897_s21 = sld [smem:[#allocation6 + $0x36]] }
  0x4e   :  { %327 = vrot.lane.b32.xlu2 %v1476_v30, %s1419_s11 }
  0x50   :  { %v192_v59 = vld.sshfl [vmem:[#allocation1 + $0x8] sm:$0xff pattern:$0x73625140]  ;;  %v191_v60 = vld.sshfl [vmem:[#allocation1] sm:$0xff pattern:$0x73625140] }
  0x51   :  { %201 = vst [vmem:[#allocation1] ss:$4 sm:$0xff] %v174_v53  ;;  %195 = vrot.lane.b32.xlu0 %v191_v60, %s1415_s3  ;;  %197 = vrot.lane.b32.xlu1 %v192_v59, %s1415_s3  ;;  %s1748_s3 = sld [smem:[#allocation6 + $0x5]] }
  0x58   :  { %v1548_v62 = vld.sshfl [vmem:[#allocation1] sm:$0xff pattern:$0x73625140]  ;;  %v1550_v63 = vld.sshfl [vmem:[#allocation1 + $0x8] sm:$0xff pattern:$0x73625140] }
  0x59   :  { %221 = vst [vmem:[#allocation1] ss:$4 sm:$0xff] %v212_v61 }
  0x60   :  { %v1553_v0 = vld.sshfl [vmem:[#allocation1] sm:$0xff pattern:$0x73625140]  ;;  %v1555_v1 = vld.sshfl [vmem:[#allocation1 + $0x8] sm:$0xff pattern:$0x73625140] }
  0x61   :  { %228 = vst [vmem:[#allocation1] ss:$4 sm:$0xff] %v1478_v31 }
  0x68   :  { %v229_v2 = vld.sshfl [vmem:[#allocation1] sm:$0xff pattern:$0x73625140]  ;;  %v230_v3 = vld.sshfl [vmem:[#allocation1 + $0x8] sm:$0xff pattern:$0x73625140] }
  0x69   :  { %239 = vst [vmem:[#allocation1] ss:$4 sm:$0xff] %v212_v61  ;;  %233 = vrot.lane.b32.xlu1 %v229_v2, %s1418_s10  ;;  %235 = vrot.lane.b32.xlu2 %v230_v3, %s1418_s10  ;;  %s1771_s10 = sld [smem:[#allocation6 + $0x38]] }
  0x70   :  { %v1560_v4 = vld.sshfl [vmem:[#allocation1] sm:$0xff pattern:$0x73625140]  ;;  %v1562_v5 = vld.sshfl [vmem:[#allocation1 + $0x8] sm:$0xff pattern:$0x73625140] }
  0x71   :  { %259 = vst [vmem:[#allocation1] ss:$4 sm:$0xff] %v1485_v32 }
  0x78   :  { %v1565_v6 = vld.sshfl [vmem:[#allocation1] sm:$0xff pattern:$0x73625140]  ;;  %v1567_v7 = vld.sshfl [vmem:[#allocation1 + $0x8] sm:$0xff pattern:$0x73625140] }
  0x79   :  { %266 = vst [vmem:[#allocation1] ss:$4 sm:$0xff] %v1478_v31 }
  0x80   :  { %v267_v8 = vld.sshfl [vmem:[#allocation1] sm:$0xff pattern:$0x73625140]  ;;  %v268_v9 = vld.sshfl [vmem:[#allocation1 + $0x8] sm:$0xff pattern:$0x73625140] }
  0x81   :  { %277 = vst [vmem:[#allocation1] ss:$4 sm:$0xff] %v1485_v32  ;;  %273 = vrot.lane.b32.xlu0 %v268_v9, %s1416_s8  ;;  %271 = vrot.lane.b32.xlu2 %v267_v8, %s1416_s8  ;;  %s1754_s8 = sld [smem:[#allocation6 + $0xc]] }
  0x88   :  { %v1573_v10 = vld.sshfl [vmem:[#allocation1] sm:$0xff pattern:$0x73625140]  ;;  %v1575_v11 = vld.sshfl [vmem:[#allocation1 + $0x8] sm:$0xff pattern:$0x73625140]  ;;  %v176_v27 = vpop.permute.xlu2 %175 }
  0x89   :  { %297 = vst [vmem:[#allocation1] ss:$4 sm:$0xff] %v1493_v35 }
  0x90   :  { %v1578_v12 = vld.sshfl [vmem:[#allocation1] sm:$0xff pattern:$0x73625140]  ;;  %v1580_v13 = vld.sshfl [vmem:[#allocation1 + $0x8] sm:$0xff pattern:$0x73625140]  ;;  %v178_v39 = vpop.permute.xlu2 %177 }
  0x91   :  { %304 = vst [vmem:[#allocation1] ss:$4 sm:$0xff] %v1478_v31 }
  0x98   :  { %v306_v14 = vld.sshfl [vmem:[#allocation1 + $0x8] sm:$0xff pattern:$0x73625140]  ;;  %v305_v15 = vld.sshfl [vmem:[#allocation1] sm:$0xff pattern:$0x73625140]  ;;  %v214_v58 = vpop.permute.xlu2 %213 }
  0x99   :  { %311 = vrot.lane.b32.xlu1 %v306_v14, %s1417_s9  ;;  %315 = vst [vmem:[#allocation1] ss:$4 sm:$0xff] %v1493_v35  ;;  %309 = vrot.lane.b32.xlu0 %v305_v15, %s1417_s9  ;;  %v138_v35 = vlaneseq  ;;  %s1756_s9 = sld [smem:[#allocation6 + $0x31]] }
  0x9b   :  { %v1624_v41 = vand.u32 127, %v138_v35 }
  0x9d   :  { %2701 = vst [vmem:[#allocation25_spill] sm:$0xff] %v1624_v41  ;;  %vm179_vm15 = vcmp.lt.s32.totalorder %v1624_v41, 32  ;;  %vm140_vm1 = vcmp.lt.s32.totalorder %v1624_v41, 48  ;;  %vm217_vm4 = vcmp.lt.s32.totalorder %v1624_v41, 16  ;;  %vm255_vm6 = vcmp.lt.s32.totalorder %v1624_v41, 112 }
  0x9e   :  { %v180_v51 = vsel %vm179_vm15, %v176_v27, %v178_v39  ;;  %v181_v53 = vsel %vm179_vm15, %v178_v39, %v176_v27  ;;  %vm293_vm7 = vcmp.lt.s32.totalorder %v1624_v41, 96  ;;  %vm331_vm14 = vcmp.lt.s32.totalorder %v1624_v41, 80 }
  0x9f   :  { %v1668_v3 = vmul.f32 %v1532_v56, %v181_v53  ;;  %v1671_v8 = vmul.f32 %v1534_v57, %v180_v51  ;;  %v362_v57 = vstv %s1622_s19  ;;  %v668_v51 = vadd.s32 4294967295, %v1498_v37  ;;  %s1869_s19 = sld [smem:[#allocation6 + $0x40]] }
  0xa0   :  { %v1586_v16 = vld.sshfl [vmem:[#allocation1] sm:$0xff pattern:$0x73625140]  ;;  %v1588_v18 = vld.sshfl [vmem:[#allocation1 + $0x8] sm:$0xff pattern:$0x73625140]  ;;  %v135_v23 = vpop.permute.xlu0 %134  ;;  %v809_v53 = vstv %s1613_s16 }
  0xa1   :  { %2695 = vst [vmem:[#allocation19_spill] sm:$0xff] %v1586_v16  ;;  %329 = vrot.lane.b32.xlu0 %v1513_v52, %s1419_s11  ;;  %v1601_v24 = vpop.permute.xlu1 %253  ;;  %vm669_vm8 = vcmp.ge.s32.totalorder %v668_v51, 0  ;;  %vm670_vm9 = vcmp.lt.s32.totalorder %v668_v51, 16  ;;  %s1826_s16 = sld [smem:[#allocation6 + $0x4f]] }
  0xa2   :  { %2696 = vst [vmem:[#allocation20_spill] sm:$0xff] %v1588_v18  ;;  %vm1809_vm11 = vmand %vm669_vm8, %vm670_vm9 }
  0xa3   :  { %335 = vst [vmem:[#allocation1] ss:$4 sm:$0xff] %v1496_v36 }
  0xa4   :  { %2704 = vst [vmem:[#allocation28_spill] sm:$0xff] %v1668_v3 }
  0xa9   :  { %v1615_v38 = vpop.permute.xlu1 %289 }
  0xaa   :  { %v1593_v19 = vld.sshfl [vmem:[#allocation1] sm:$0xff pattern:$0x73625140]  ;;  %v1595_v20 = vld.sshfl [vmem:[#allocation1 + $0x8] sm:$0xff pattern:$0x73625140] }
  0xab   :  { %2697 = vst [vmem:[#allocation21_spill] sm:$0xff] %v1593_v19 }
  0xac   :  { %2698 = vst [vmem:[#allocation22_spill] sm:$0xff] %v1595_v20 }
  0xad   :  { %342 = vst [vmem:[#allocation1] ss:$4 sm:$0xff] %v1478_v31 }
  0xb1   :  { %v1644_v50 = vpop.permute.xlu1 %157 }
  0xb4   :  { %v343_v21 = vld.sshfl [vmem:[#allocation1] sm:$0xff pattern:$0x73625140]  ;;  %v344_v22 = vld.sshfl [vmem:[#allocation1 + $0x8] sm:$0xff pattern:$0x73625140] }
  0xb5   :  { %347 = vrot.lane.b32.xlu1 %v343_v21, %s1419_s11  ;;  %349 = vrot.lane.b32.xlu2 %v344_v22, %s1419_s11  ;;  %353 = vst [vmem:[#allocation1] ss:$4 sm:$0xff] %v1496_v36  ;;  %v137_v36 = vpop.permute.xlu0 %136  ;;  %v370_v21 = vstv %s1626_s20  ;;  %v2654_v22 = vstv %s1635_s22  ;;  %s1773_s11 = sld [smem:[#allocation6 + $0x3f]] }
  0xb6   :  { %v141_v59 = vsel %vm140_vm1, %v135_v23, %v137_v36  ;;  %v142_v60 = vsel %vm140_vm1, %v137_v36, %v135_v23  ;;  %v2653_v23 = vstv %s1640_s24  ;;  %v372_v36 = vmul.f32 %v370_v21, %v1671_v8  ;;  %s1884_s20 = sld [smem:[#allocation6 + $0x4e]] }
  0xb7   :  { %v1678_v9 = vmul.f32 %v1487_v33, %v142_v60  ;;  %v1681_v14 = vmul.f32 %v1489_v34, %v141_v59  ;;  %v611_v33 = vstv %s1609_s14  ;;  %v565_v34 = vsel %vm564_vm5, 1.0, %v2655_v17  ;;  %s1815_s14 = sld [smem:[#allocation6 + $0x4d]] }
  0xb8   :  { %v612_v39 = vmul.f32 %v611_v33, %v1478_v31  ;;  %v371_v60 = vmul.f32 %v370_v21, %v1668_v3  ;;  %v1027_v17 = vstv %s1619_s18  ;;  %s1857_s18 = sld [smem:[#allocation6 + $0x39]] }
  0xb9   :  { %2705 = vst [vmem:[#allocation29_spill] sm:$0xff] %v1678_v9  ;;  %v364_v35 = vmul.f32 %v362_v57, %v1681_v14  ;;  %v363_v59 = vmul.f32 %v362_v57, %v1678_v9 }
  0xbc   :  { %v1605_v29 = vld.sshfl [vmem:[#allocation1] sm:$0xff pattern:$0x73625140]  ;;  %v1607_v32 = vld.sshfl [vmem:[#allocation1 + $0x8] sm:$0xff pattern:$0x73625140] }
  0xbd   :  { %2699 = vst [vmem:[#allocation23_spill] sm:$0xff] %v1605_v29  ;;  %v216_v47 = vpop.permute.xlu0 %215  ;;  %v518_v29 = vstv %s1732_s7  ;;  %s2003_s7 = sld [smem:[#allocation6 + $0x52]] }
  0xbe   :  { %2700 = vst [vmem:[#allocation24_spill] sm:$0xff] %v1607_v32  ;;  %v218_v15 = vsel %vm217_vm4, %v214_v58, %v216_v47  ;;  %v219_v56 = vsel %vm217_vm4, %v216_v47, %v214_v58  ;;  %v2657_v47 = vstv %s1655_s27  ;;  %v292_v58 = vpop.permute.xlu2 %291 }
  0xbf   :  { %402 = vst [vmem:[#allocation1] ss:$4 sm:$0xff] %v398_v28  ;;  %v1700_v25 = vmul.f32 %v1553_v0, %v219_v56  ;;  %v1703_v26 = vmul.f32 %v1555_v1, %v218_v15  ;;  %v1708_v28 = vpop.permute.xlu1 %159  ;;  %v577_v0 = vmul.f32 %v2654_v22, %v1678_v9  ;;  %v585_v1 = vmul.f32 %v2653_v23, %v1668_v3 }
  0xc0   :  { %v918_v15 = vstv %s1617_s17  ;;  %v866_v22 = vadd.s32 1, %v1498_v37  ;;  %v295_v37 = vsel %vm293_vm7, %v292_v58, %v1615_v38  ;;  %s1845_s17 = sld [smem:[#allocation6 + $0x32]] }
  0xc1   :  { %2706 = vst [vmem:[#allocation30_spill] sm:$0xff] %v1700_v25  ;;  %v384_v57 = vmul.f32 %v382_v44, %v1703_v26  ;;  %v590_v23 = vadd.f32 %v585_v1, %v577_v0  ;;  %v597_v21 = vmul.f32 %v2657_v47, %v1700_v25 }
  0xc2   :  { %2707 = vst [vmem:[#allocation31_spill] sm:$0xff] %v1703_v26  ;;  %vm867_vm10 = vcmp.ge.s32.totalorder %v866_v22, 0  ;;  %vm868_vm12 = vcmp.lt.s32.totalorder %v866_v22, 16 }
  0xc3   :  { %vm1849_vm13 = vmand %vm867_vm10, %vm868_vm12  ;;  %2732 = sst [smem:[#allocation45_spill]] %s2003_s7 }
  0xc5   :  { %v252_v27 = vpop.permute.xlu0 %251 }
  0xc6   :  { %v1628_v42 = vld.sshfl [vmem:[#allocation1] sm:$0xff pattern:$0x73625140]  ;;  %v1630_v43 = vld.sshfl [vmem:[#allocation1 + $0x8] sm:$0xff pattern:$0x73625140]  ;;  %v256_v56 = vsel %vm255_vm6, %v252_v27, %v1601_v24  ;;  %v257_v33 = vsel %vm255_vm6, %v1601_v24, %v252_v27  ;;  %v376_v24 = vadd.f32 %v371_v60, %v363_v59  ;;  %v383_v27 = vmul.f32 %v382_v44, %v1700_v25 }
  0xc7   :  { %460 = vst [vmem:[#allocation1] ss:$4 sm:$0xff] %v458_v40  ;;  %v720_v40 = vstv %s1611_s15  ;;  %v1769_v0 = vmul.f32 %v1567_v7, %v257_v33  ;;  %v602_v59 = vadd.f32 %v597_v21, %v590_v23  ;;  %v411_v7 = vstv %s1646_s25  ;;  %v198_v33 = vpop.permute.xlu1 %197  ;;  %s1822_s15 = sld [smem:[#allocation6 + $0x41]] }
  0xc8   :  { %v1780_v47 = vmul.f32 %v720_v40, %v1478_v31  ;;  %v1792_v23 = vmul.f32 %v918_v15, %v1478_v31  ;;  %v388_v40 = vadd.f32 %v383_v27, %v376_v24  ;;  %v469_v15 = vstv %s1693_s30  ;;  %v1813_v24 = vpop.permute.xlu2 %327  ;;  %s1907_s25 = sld [smem:[#allocation6 + $0x54]] }
  0xc9   :  { %v477_v21 = vstv %s1696_s5  ;;  %2712 = vst [vmem:[#allocation34_spill] sm:$0xff] %v1813_v24  ;;  %s1925_s30 = sld [smem:[#allocation6 + $0x55]]  ;;  %v2728_v24 = vstv %s1665_s28 }
  0xca   :  { %s1966_s5 = sld [smem:[#allocation6 + $0x1a]]  ;;  %v610_v16 = vmul.f32 %v2728_v24, %v1513_v52  ;;  %v492_v24 = vstv %s1869_s19 }
  0xcb   :  { %s2104_s19 = sld [smem:[#allocation6 + $0x20]] }
  0xce   :  { %v1661_v61 = vld.sshfl [vmem:[#allocation1] sm:$0xff pattern:$0x73625140]  ;;  %v1663_v2 = vld.sshfl [vmem:[#allocation1 + $0x8] sm:$0xff pattern:$0x73625140] }
  0xcf   :  { %2702 = vst [vmem:[#allocation26_spill] sm:$0xff] %v1661_v61  ;;  %v2658_v61 = vstv %s1665_s28  ;;  %s1984_s28 = sld [smem:[#allocation6 + $0x2b]] }
  0xd0   :  { %2703 = vst [vmem:[#allocation27_spill] sm:$0xff] %v1663_v2  ;;  %v394_v2 = vstv %s1637_s23  ;;  %v609_v60 = vmul.f32 %v2658_v61, %v1476_v30  ;;  %s1905_s23 = sld [smem:[#allocation6 + $0x3d]] }
  0xd1   :  { %509 = vst [vmem:[#allocation1] ss:$4 sm:$0xff] %v505_v46  ;;  %v396_v44 = vmul.f32 %v394_v2, %v1513_v52 }
  0xd8   :  { %v1723_v45 = vld.sshfl [vmem:[#allocation1] sm:$0xff pattern:$0x73625140]  ;;  %v1725_v46 = vld.sshfl [vmem:[#allocation1 + $0x8] sm:$0xff pattern:$0x73625140] }
  0xd9   :  { %567 = vst [vmem:[#allocation1] ss:$4 sm:$0xff] %v565_v34  ;;  %v377_v34 = vadd.f32 %v372_v36, %v364_v35  ;;  %v294_v35 = vsel %vm293_vm7, %v1615_v38, %v292_v58  ;;  %v1766_v36 = vmul.f32 %v1565_v6, %v256_v56  ;;  %v1783_v6 = vmul.f32 %v809_v53, %v1478_v31 }
  0xda   :  { %v2659_v56 = vstv %s1673_s2  ;;  %v395_v53 = vmul.f32 %v394_v2, %v1476_v30 }
  0xdb   :  { %v389_v1 = vadd.f32 %v384_v57, %v377_v34  ;;  %v1798_v34 = vmul.f32 %v1578_v12, %v294_v35  ;;  %v1801_v57 = vmul.f32 %v1580_v13, %v295_v37  ;;  %v413_v12 = vmul.f32 %v411_v7, %v1769_v0 }
  0xdc   :  { %v613_v13 = vadd.f32 %v609_v60, %v602_v59  ;;  %v626_v27 = vmul.f32 %v2659_v56, %v1766_v36  ;;  %v423_v35 = vstv %s1648_s26  ;;  %v412_v37 = vmul.f32 %v411_v7, %v1766_v36  ;;  %s1921_s26 = sld [smem:[#allocation6 + $0x56]] }
  0xdd   :  { %v400_v2 = vadd.f32 %v396_v44, %v389_v1  ;;  %v399_v61 = vadd.f32 %v395_v53, %v388_v40  ;;  %v471_v1 = vmul.f32 %v469_v15, %v1681_v14  ;;  %v479_v44 = vmul.f32 %v477_v21, %v1671_v8 }
  0xde   :  { %v2713_v59 = vmov 0.0   ;;  %v1835_v56 = vmul.f32 %v1027_v17, %v1478_v31  ;;  %v161_v7 = vsel %vm140_vm1, %v1644_v50, %v1708_v28  ;;  %v162_v40 = vsel %vm140_vm1, %v1708_v28, %v1644_v50  ;;  %v196_v17 = vpop.permute.xlu0 %195 }
  0xdf   :  { %v672_v60 = vsel %vm1809_vm11, 1.0, %v2713_v59  ;;  %v418_v31 = vadd.f32 %v413_v12, %v400_v2  ;;  %v631_v51 = vadd.f32 %v626_v27, %v613_v13  ;;  %v199_v50 = vsel %vm179_vm15, %v196_v17, %v198_v33 }
  0xe0   :  { %v1786_v38 = vld.sshfl [vmem:[#allocation1] sm:$0xff pattern:$0x73625140]  ;;  %v1788_v58 = vld.sshfl [vmem:[#allocation1 + $0x8] sm:$0xff pattern:$0x73625140]  ;;  %v200_v22 = vsel %vm179_vm15, %v198_v33, %v196_v17  ;;  %v424_v32 = vmul.f32 %v423_v35, %v1798_v34  ;;  %v417_v13 = vadd.f32 %v412_v37, %v399_v61  ;;  %v484_v27 = vadd.f32 %v479_v44, %v471_v1  ;;  %v234_v44 = vpop.permute.xlu1 %233 }
  0xe1   :  { %2708 = vst [vmem:[#allocation32_spill] sm:$0xff] %v1786_v38  ;;  %v2717_v38 = vstv %s1687_s29  ;;  %v1876_v20 = vsel %vm1849_vm13, 1.0, %v2713_v59  ;;  %v1879_v33 = vmul.f32 %v1522_v54, %v162_v40  ;;  %v530_v61 = vstv %s1742_s1  ;;  %s2012_s1 = sld [smem:[#allocation6 + $0x28]] }
  0xe2   :  { %2709 = vst [vmem:[#allocation33_spill] sm:$0xff] %v1788_v58  ;;  %v489_v58 = vstv %s1706_s6  ;;  %v638_v49 = vmul.f32 %v2717_v38, %v1798_v34  ;;  %v501_v38 = vstv %s1718_s0  ;;  %v1888_v37 = vmul.f32 %v1548_v62, %v200_v22  ;;  %s1973_s6 = sld [smem:[#allocation6 + $0x21]] }
  0xe3   :  { %616 = vst [vmem:[#allocation1] ss:$4 sm:$0xff] %v612_v39  ;;  %v425_v39 = vmul.f32 %v423_v35, %v1801_v57  ;;  %v491_v2 = vmul.f32 %v489_v58, %v1703_v26  ;;  %v1882_v35 = vmul.f32 %v1524_v55, %v161_v7  ;;  %v1891_v1 = vmul.f32 %v1550_v63, %v199_v50  ;;  %v236_v7 = vpop.permute.xlu2 %235  ;;  %s1975_s0 = sld [smem:[#allocation6 + $0x2a]] }
  0xe4   :  { %2714 = vst [vmem:[#allocation35_spill] sm:$0xff] %v1835_v56  ;;  %v1895_v59 = vadd.f32 %v638_v49, %v631_v51  ;;  %v503_v54 = vmul.f32 %v501_v38, %v1513_v52  ;;  %v1901_v55 = vmul.f32 %v518_v29, %v1769_v0  ;;  %v470_v62 = vmul.f32 %v469_v15, %v1678_v9 }
  0xe5   :  { %2718 = vst [vmem:[#allocation36_spill] sm:$0xff] %v1879_v33  ;;  %v478_v63 = vmul.f32 %v477_v21, %v1668_v3  ;;  %v1909_v49 = vadd.f32 %v424_v32, %v417_v13  ;;  %v496_v51 = vadd.f32 %v491_v2, %v484_v27  ;;  %v1912_v40 = vmul.f32 %v530_v61, %v1801_v57 }
  0xe6   :  { %2719 = vst [vmem:[#allocation37_spill] sm:$0xff] %v1888_v37  ;;  %v490_v53 = vmul.f32 %v489_v58, %v1700_v25  ;;  %v237_v15 = vsel %vm217_vm4, %v234_v44, %v236_v7  ;;  %v238_v21 = vsel %vm217_vm4, %v236_v7, %v234_v44  ;;  %v365_v17 = vstv %s1756_s9  ;;  %s2018_s9 = sld [smem:[#allocation6 + $0x4]] }
  0xe7   :  { %2721 = vst [vmem:[#allocation39_spill] sm:$0xff] %v1895_v59  ;;  %v579_v32 = vstv %s1794_s12  ;;  %v502_v50 = vmul.f32 %v501_v38, %v1476_v30  ;;  %v1929_v22 = vmul.f32 %v518_v29, %v1766_v36  ;;  %v483_v58 = vadd.f32 %v478_v63, %v470_v62  ;;  %2735 = sst [smem:[#allocation46_spill]] %s2012_s1 }
  0xe8   :  { %2722 = vst [vmem:[#allocation40_spill] sm:$0xff] %v1909_v49  ;;  %v1932_v2 = vmul.f32 %v530_v61, %v1798_v34  ;;  %v2723_v13 = vstv %s1635_s22  ;;  %v2724_v44 = vstv %s1640_s24  ;;  %v1945_v29 = vmul.f32 %v1560_v4, %v238_v21  ;;  %s1953_s22 = sld [smem:[#allocation6 + $0x13]] }
  0xe9   :  { %v578_v27 = vmul.f32 %v2723_v13, %v1681_v14  ;;  %v586_v7 = vmul.f32 %v2724_v44, %v1671_v8  ;;  %v1948_v62 = vmul.f32 %v1562_v5, %v237_v15  ;;  %v367_v61 = vmul.f32 %v365_v17, %v1882_v35  ;;  %s1959_s24 = sld [smem:[#allocation6 + $0x44]] }
  0xea   :  { %v1863_v28 = vld.sshfl [vmem:[#allocation1] sm:$0xff pattern:$0x73625140]  ;;  %v1867_v12 = vld.sshfl [vmem:[#allocation1 + $0x8] sm:$0xff pattern:$0x73625140]  ;;  %v580_v13 = vmul.f32 %v579_v32, %v1879_v33  ;;  %v385_v4 = vstv %s1773_s11  ;;  %v599_v5 = vstv %s1822_s15  ;;  %v507_v15 = vadd.f32 %v503_v54, %v496_v51 }
  0xeb   :  { %674 = vst [vmem:[#allocation1] ss:$4 sm:$0xff] %v672_v60  ;;  %v1893_v60 = vadd.f32 %v425_v39, %v418_v31  ;;  %v373_v31 = vstv %s1771_s10  ;;  %v587_v39 = vstv %s1803_s13  ;;  %v2727_v21 = vstv %s1655_s27  ;;  %s1981_s27 = sld [smem:[#allocation6 + $0x2c]] }
  0xec   :  { %v375_v63 = vmul.f32 %v373_v31, %v1891_v1  ;;  %v588_v44 = vmul.f32 %v587_v39, %v1888_v37  ;;  %v598_v59 = vmul.f32 %v2727_v21, %v1703_v26  ;;  %v495_v19 = vadd.f32 %v490_v53, %v483_v58  ;;  %s2025_s10 = sld [smem:[#allocation6 + $0x35]] }
  0xed   :  { %2720 = vst [vmem:[#allocation38_spill] sm:$0xff] %v1893_v60  ;;  %v374_v60 = vmul.f32 %v373_v31, %v1888_v37  ;;  %v591_v21 = vadd.f32 %v586_v7, %v578_v27  ;;  %v600_v53 = vmul.f32 %v599_v5, %v1945_v29  ;;  %v386_v7 = vmul.f32 %v385_v4, %v1945_v29  ;;  %s2032_s11 = sld [smem:[#allocation6 + $0xb]] }
  0xee   :  { %v379_v18 = vadd.f32 %v375_v63, %v367_v61  ;;  %v592_v56 = vadd.f32 %v588_v44, %v580_v13  ;;  %v581_v13 = vmul.f32 %v579_v32, %v1882_v35  ;;  %v589_v44 = vmul.f32 %v587_v39, %v1891_v1  ;;  %s2062_s12 = sld [smem:[#allocation6 + $0x2f]] }
  0xef   :  { %v2731_v63 = vstv %s1673_s2  ;;  %v493_v32 = vmul.f32 %v492_v24, %v1945_v29  ;;  %v2733_v39 = vstv %s1748_s3  ;;  %s2015_s2 = sld [smem:[#allocation6 + $0x59]] }
  0xf0   :  { %v627_v61 = vmul.f32 %v2731_v63, %v1769_v0  ;;  %v601_v63 = vmul.f32 %v599_v5, %v1948_v62  ;;  %s2069_s13 = sld [smem:[#allocation6 + $0x12]] }
  0xf1   :  { %s2080_s15 = sld [smem:[#allocation6 + $0x43]] }
  0xf2   :  { %v1940_v49 = vld.sshfl [vmem:[#allocation1] sm:$0xff pattern:$0x73625140]  ;;  %v1942_v38 = vld.sshfl [vmem:[#allocation1 + $0x8] sm:$0xff pattern:$0x73625140] }
  0xf3   :  { %2725 = vst [vmem:[#allocation41_spill] sm:$0xff] %v1940_v49  ;;  %v480_v49 = vstv %s1857_s18  ;;  %s2093_s18 = sld [smem:[#allocation6 + $0x5b]] }
  0xf4   :  { %2726 = vst [vmem:[#allocation42_spill] sm:$0xff] %v1942_v38  ;;  %v472_v38 = vstv %s1845_s17  ;;  %v482_v51 = vmul.f32 %v480_v49, %v1891_v1  ;;  %v481_v58 = vmul.f32 %v480_v49, %v1888_v37  ;;  %v525_v49 = vadd.f32 %v1901_v55, %v507_v15  ;;  %s2089_s17 = sld [smem:[#allocation6 + $0x19]] }
  0xf5   :  { %725 = vst [vmem:[#allocation1] ss:$4 sm:$0xff] %v1780_v47  ;;  %v366_v47 = vmul.f32 %v365_v17, %v1879_v33  ;;  %v474_v54 = vmul.f32 %v472_v38, %v1882_v35  ;;  %v387_v17 = vmul.f32 %v385_v4, %v1948_v62  ;;  %v473_v31 = vmul.f32 %v472_v38, %v1879_v33 }
  0xf6   :  { %v494_v38 = vmul.f32 %v492_v24, %v1948_v62  ;;  %v884_v4 = vmul.f32 %v2733_v39, %v1678_v9  ;;  %v603_v15 = vadd.f32 %v598_v59, %v591_v21  ;;  %v593_v24 = vadd.f32 %v589_v44, %v581_v13 }
  0xf7   :  { %v378_v27 = vadd.f32 %v374_v60, %v366_v47  ;;  %v486_v26 = vadd.f32 %v482_v51, %v474_v54  ;;  %v391_v60 = vadd.f32 %v387_v17, %v379_v18  ;;  %v2734_v47 = vstv %s1754_s8 }
  0xf8   :  { %v892_v54 = vmul.f32 %v2734_v47, %v1668_v3  ;;  %v485_v55 = vadd.f32 %v481_v58, %v473_v31  ;;  %v2669_v51 = vstv %s1953_s22  ;;  %v604_v18 = vadd.f32 %v600_v53, %v592_v56 }
  0xf9   :  { %v390_v17 = vadd.f32 %v386_v7, %v378_v27  ;;  %v414_v39 = vstv %s1815_s14  ;;  %v628_v47 = vstv %s1826_s16  ;;  %v2736_v31 = vstv %s1687_s29  ;;  %s2036_s29 = sld [smem:[#allocation6 + $0x3c]] }
  0xfa   :  { %v639_v58 = vmul.f32 %v2736_v31, %v1801_v57  ;;  %v2670_v59 = vstv %s1905_s23  ;;  %v904_v56 = vmul.f32 %v2669_v51, %v1700_v25  ;;  %v497_v5 = vadd.f32 %v493_v32, %v485_v55  ;;  %v274_v32 = vpop.permute.xlu0 %273  ;;  %s2174_s14 = sld [smem:[#allocation6 + $0x58]] }
  0xfb   :  { %v2667_v53 = vstv %s1966_s5  ;;  %v2039_v27 = vadd.f32 %v1630_v43, %v391_v60  ;;  %v2042_v7 = vadd.f32 %v1863_v28, %v604_v18  ;;  %v2045_v13 = vadd.f32 %v1628_v42, %v390_v17  ;;  %s2205_s16 = sld [smem:[#allocation6 + $0x45]] }
  0xfc   :  { %v1993_v52 = vld.sshfl [vmem:[#allocation1] sm:$0xff pattern:$0x73625140]  ;;  %v1995_v48 = vld.sshfl [vmem:[#allocation1 + $0x8] sm:$0xff pattern:$0x73625140]  ;;  %v605_v44 = vadd.f32 %v601_v63, %v593_v24  ;;  %v895_v42 = vmul.f32 %v2670_v59, %v1888_v37  ;;  %v2668_v28 = vstv %s1959_s24  ;;  %v916_v55 = vmul.f32 %v2667_v53, %v1476_v30 }
  0xfd   :  { %2729 = vst [vmem:[#allocation43_spill] sm:$0xff] %v1993_v52  ;;  %v774_v31 = vstv %s2018_s9  ;;  %s2135_s9 = sld [smem:[#allocation6 + $0x27]] }
  0xfe   :  { %2730 = vst [vmem:[#allocation44_spill] sm:$0xff] %v1995_v48  ;;  %v498_v48 = vadd.f32 %v494_v38, %v486_v26  ;;  %v614_v26 = vadd.f32 %v610_v16, %v603_v15  ;;  %v272_v16 = vpop.permute.xlu2 %271  ;;  %v775_v53 = vmul.f32 %v774_v31, %v1678_v9 }
  0xff   :  { %814 = vst [vmem:[#allocation1] ss:$4 sm:$0xff] %v1783_v6  ;;  %v506_v6 = vadd.f32 %v502_v50, %v495_v19  ;;  %v2671_v19 = vstv %s1897_s21  ;;  %v897_v50 = vadd.f32 %v892_v54, %v884_v4  ;;  %v521_v4 = vstv %s1884_s20  ;;  %s2186_s20 = sld [smem:[#allocation6 + $0x14]] }
 0x100   :  { %v2053_v54 = vadd.f32 %v1912_v40, %v525_v49  ;;  %v887_v43 = vmul.f32 %v2671_v19, %v1879_v33  ;;  %v2666_v40 = vstv %s1973_s6  ;;  %v2075_v49 = vadd.f32 %v1723_v45, %v497_v5 }
 0x101   :  { %v524_v21 = vadd.f32 %v1929_v22, %v506_v6  ;;  %v909_v60 = vadd.f32 %v904_v56, %v897_v50  ;;  %v632_v15 = vadd.f32 %v627_v61, %v614_v26  ;;  %v276_v18 = vsel %vm255_vm6, %v274_v32, %v272_v16 }
 0x102   :  { %v275_v45 = vsel %vm255_vm6, %v272_v16, %v274_v32  ;;  %v933_v61 = vmul.f32 %v2666_v40, %v1766_v36  ;;  %v782_v50 = vstv %s2032_s11  ;;  %v2107_v56 = vmul.f32 %v1575_v11, %v276_v18  ;;  %s2150_s11 = sld [smem:[#allocation6 + $0xd]] }
 0x103   :  { %v2078_v6 = vadd.f32 %v1932_v2, %v524_v21  ;;  %v907_v2 = vmul.f32 %v2668_v28, %v1945_v29  ;;  %v920_v63 = vadd.f32 %v916_v55, %v909_v60  ;;  %v2109_v5 = vadd.f32 %v639_v58, %v632_v15 }
 0x104   :  { %v777_v21 = vstv %s2025_s10  ;;  %v785_v26 = vstv %s2036_s29  ;;  %v2672_v11 = vstv %s2003_s7  ;;  %v776_v60 = vmul.f32 %v774_v31, %v1681_v14  ;;  %s2142_s10 = sld [smem:[#allocation6 + $0x6]] }
 0x105   :  { %v784_v55 = vmul.f32 %v782_v50, %v1671_v8  ;;  %v2137_v15 = vadd.f32 %v933_v61, %v920_v63  ;;  %v787_v18 = vmul.f32 %v785_v26, %v1891_v1  ;;  %v797_v40 = vstv %s2080_s15  ;;  %s2160_s29 = sld [smem:[#allocation6 + $0x37]] }
 0x106   :  { %v2047_v38 = vld.sshfl [vmem:[#allocation1] sm:$0xff pattern:$0x73625140]  ;;  %v2049_v22 = vld.sshfl [vmem:[#allocation1 + $0x8] sm:$0xff pattern:$0x73625140]  ;;  %v783_v28 = vmul.f32 %v782_v50, %v1668_v3  ;;  %v523_v51 = vmul.f32 %v521_v4, %v2107_v56  ;;  %v806_v31 = vstv %s2089_s17  ;;  %v630_v50 = vmul.f32 %v628_v47, %v2107_v56 }
 0x107   :  { %872 = vst [vmem:[#allocation1] ss:$4 sm:$0xff] %v1876_v20  ;;  %v2072_v20 = vadd.f32 %v1725_v46, %v498_v48  ;;  %v2087_v48 = vadd.f32 %v1867_v12, %v605_v44  ;;  %v899_v46 = vadd.f32 %v895_v42, %v887_v43  ;;  %v2665_v12 = vstv %s2012_s1  ;;  %s2214_s15 = sld [smem:[#allocation6 + $0x1b]] }
 0x108   :  { %v2116_v44 = vmul.f32 %v1573_v10, %v275_v45  ;;  %v2131_v10 = vmul.f32 %v2665_v12, %v1798_v34  ;;  %v794_v45 = vstv %s2069_s13  ;;  %v789_v19 = vadd.f32 %v784_v55, %v776_v60  ;;  %v2739_v12 = vld [vmem:[#allocation31_spill] sm:$0xff]  ;;  %s2167_s13 = sld [smem:[#allocation6 + $0x3e]] }
 0x109   :  { %v2126_v42 = vadd.f32 %v907_v2, %v899_v46  ;;  %v416_v46 = vmul.f32 %v414_v39, %v2107_v56  ;;  %v796_v2 = vmul.f32 %v794_v45, %v2739_v12  ;;  %v778_v55 = vmul.f32 %v777_v21, %v1879_v33  ;;  %s2216_s17 = sld [smem:[#allocation6 + $0x5d]] }
 0x10a   :  { %v629_v61 = vmul.f32 %v628_v47, %v2116_v44  ;;  %v415_v63 = vmul.f32 %v414_v39, %v2116_v44  ;;  %v522_v58 = vmul.f32 %v521_v4, %v2116_v44  ;;  %v799_v39 = vmul.f32 %v797_v40, %v1948_v62  ;;  %s2241_s1 = sld [smem:[#allocation6 + $0x29]] }
 0x10b   :  { %v2182_v60 = vmul.f32 %v2672_v11, %v2116_v44  ;;  %v786_v59 = vmul.f32 %v785_v26, %v1888_v37  ;;  %v2189_v4 = vadd.f32 %v416_v46, %v2039_v27  ;;  %v788_v24 = vadd.f32 %v783_v28, %v775_v53  ;;  %v2741_v26 = vld [vmem:[#allocation16_spill] sm:$0xff]  ;;  %v2742_v27 = vld [vmem:[#allocation18_spill] sm:$0xff]  ;;  %s2248_s7 = sld [smem:[#allocation6 + $0x2e]] }
 0x10c   :  { %v795_v11 = vmul.f32 %v794_v45, %v1700_v25  ;;  %v801_v17 = vadd.f32 %v796_v2, %v789_v19  ;;  %v808_v46 = vmul.f32 %v806_v31, %v2742_v27  ;;  %v2211_v53 = vadd.f32 %v522_v58, %v2075_v49 }
 0x10d   :  { %v826_v45 = vstv %s2113_s4  ;;  %v790_v19 = vadd.f32 %v786_v59, %v778_v55  ;;  %v2676_v2 = vstv %s2142_s10  ;;  %v807_v58 = vmul.f32 %v806_v31, %v1476_v30  ;;  %s2231_s4 = sld [smem:[#allocation6 + $0x22]] }
 0x10e   :  { %v2119_v32 = vld.sshfl [vmem:[#allocation1] sm:$0xff pattern:$0x73625140]  ;;  %v2121_v43 = vld.sshfl [vmem:[#allocation1 + $0x8] sm:$0xff pattern:$0x73625140]  ;;  %v812_v59 = vadd.f32 %v808_v46, %v801_v17  ;;  %v2245_v17 = vadd.f32 %v2131_v10, %v2137_v15  ;;  %v1012_v31 = vstv %s2186_s20 }
 0x10f   :  { %2737 = vst [vmem:[#allocation47_spill] sm:$0xff] %v2119_v32  ;;  %v1015_v32 = vstv %s2205_s16  ;;  %s1425_s20 = smov 125   ;;  %s1218_s16 = sld [smem:[#allocation6 + $0x5e]] }
 0x110   :  { %2738 = vst [vmem:[#allocation48_spill] sm:$0xff] %v2121_v43  ;;  %v823_v43 = vstv %s2104_s19  ;;  %s2221_s19 = sld [smem:[#allocation6 + $0x5c]] }
 0x111   :  { %923 = vst [vmem:[#allocation1] ss:$4 sm:$0xff] %v1792_v23  ;;  %v779_v23 = vmul.f32 %v777_v21, %v1882_v35  ;;  %v2200_v21 = vadd.f32 %v415_v63, %v2045_v13  ;;  %v798_v13 = vmul.f32 %v797_v40, %v1945_v29  ;;  %v825_v49 = vmul.f32 %v823_v43, %v1769_v0 }
 0x112   :  { %v2677_v40 = vstv %s2160_s29  ;;  %v2678_v63 = vstv %s2167_s13 }
 0x113   :  { %v791_v16 = vadd.f32 %v787_v18, %v779_v23  ;;  %v2192_v23 = vadd.f32 %v629_v61, %v2042_v7  ;;  %v2208_v7 = vadd.f32 %v523_v51, %v2072_v20  ;;  %v2675_v51 = vstv %s2150_s11 }
 0x114   :  { %v2224_v20 = vadd.f32 %v630_v50, %v2087_v48  ;;  %v828_v61 = vmul.f32 %v826_v45, %v2107_v56  ;;  %v835_v48 = vstv %s2135_s9  ;;  %v994_v50 = vmul.f32 %v2676_v2, %v1681_v14  ;;  %s2263_s9 = sld [smem:[#allocation6 + $0x60]] }
 0x115   :  { %v803_v28 = vadd.f32 %v799_v39, %v791_v16  ;;  %v800_v16 = vadd.f32 %v795_v11, %v788_v24  ;;  %v310_v39 = vpop.permute.xlu0 %309  ;;  %v1002_v24 = vmul.f32 %v2675_v51, %v1671_v8  ;;  %v824_v2 = vmul.f32 %v823_v43, %v1766_v36 }
 0x116   :  { %v997_v10 = vmul.f32 %v2677_v40, %v1882_v35  ;;  %v1005_v15 = vmul.f32 %v2678_v63, %v1891_v1  ;;  %v837_v11 = vmul.f32 %v835_v48, %v1801_v57 }
 0x117   :  { %v820_v55 = vadd.f32 %v2049_v22, %v803_v28  ;;  %v802_v22 = vadd.f32 %v798_v13, %v790_v19  ;;  %v811_v51 = vadd.f32 %v807_v58, %v800_v16  ;;  %v2745_v19 = vld [vmem:[#allocation35_spill] sm:$0xff]  ;;  %v830_v13 = vadd.f32 %v825_v49, %v812_v59 }
 0x118   :  { %v2194_v18 = vld.sshfl [vmem:[#allocation1] sm:$0xff pattern:$0x73625140]  ;;  %v2196_v47 = vld.sshfl [vmem:[#allocation1 + $0x8] sm:$0xff pattern:$0x73625140]  ;;  %v1007_v43 = vadd.f32 %v1002_v24, %v994_v50  ;;  %v1014_v58 = vmul.f32 %v1012_v31, %v2739_v12  ;;  %v827_v59 = vmul.f32 %v826_v45, %v2116_v44  ;;  %v1009_v50 = vadd.f32 %v1005_v15, %v997_v10 }
 0x119   :  { %2740 = vst [vmem:[#allocation31_spill] sm:$0xff] %v2196_v47  ;;  %v2269_v16 = vadd.f32 %v828_v61, %v820_v55  ;;  %v819_v49 = vadd.f32 %v2047_v38, %v802_v22  ;;  %v928_v61 = vadd.f32 %v2194_v18, %v2126_v42  ;;  %v829_v55 = vadd.f32 %v824_v2, %v811_v51  ;;  %v2747_v22 = vld [vmem:[#allocation20_spill] sm:$0xff]  ;;  %v2748_v10 = vld [vmem:[#allocation19_spill] sm:$0xff] }
 0x11a   :  { %981 = vst [vmem:[#allocation1] ss:$4 sm:$0xff] %v2741_v26  ;;  %v312_v26 = vpop.permute.xlu1 %311  ;;  %v1017_v24 = vmul.f32 %v1015_v32, %v1948_v62  ;;  %v2284_v52 = vadd.f32 %v837_v11, %v830_v13  ;;  %v2746_v38 = vstv %s2214_s15  ;;  %v1019_v42 = vadd.f32 %v1014_v58, %v1007_v43 }
 0x11b   :  { %v314_v63 = vsel %vm293_vm7, %v312_v26, %v310_v39  ;;  %v313_v40 = vsel %vm293_vm7, %v310_v39, %v312_v26  ;;  %v1026_v45 = vmul.f32 %v2746_v38, %v2742_v27  ;;  %v2680_v18 = vstv %s2231_s4  ;;  %v2753_v38 = vld [vmem:[#allocation34_spill] sm:$0xff] }
 0x11c   :  { %v2679_v2 = vstv %s2241_s1  ;;  %v831_v26 = vadd.f32 %v827_v59, %v819_v49  ;;  %v2300_v15 = vmul.f32 %v2748_v10, %v313_v40  ;;  %v940_v13 = vadd.f32 %v2182_v60, %v928_v61 }
 0x11d   :  { %v2305_v58 = vadd.f32 %v1017_v24, %v1009_v50  ;;  %v1043_v49 = vmul.f32 %v2680_v18, %v1769_v0  ;;  %v1055_v40 = vmul.f32 %v2679_v2, %v1801_v57  ;;  %v2749_v59 = vstv %s2142_s10  ;;  %s1424_s10 = smov 127  }
 0x11e   :  { %v2750_v60 = vstv %s1907_s25  ;;  %v1030_v61 = vadd.f32 %v1026_v45, %v1019_v42  ;;  %v2752_v24 = vstv %s2150_s11  ;;  %v1013_v45 = vmul.f32 %v1012_v31, %v1700_v25  ;;  %s2584_s11 = sld [smem:[#allocation6 + $0x50]] }
 0x11f   :  { %v1001_v10 = vmul.f32 %v2752_v24, %v1668_v3  ;;  %v2755_v42 = vstv %s1921_s26  ;;  %v2757_v51 = vstv %s1925_s30  ;;  %s2375_s26 = sld [smem:[#allocation6 + $0x30]] }
 0x120   :  { %v2758_v11 = vmov %v2757_v51  ;;  %v1048_v47 = vadd.f32 %v1043_v49, %v1030_v61  ;;  %v350_v49 = vpop.permute.xlu2 %349  ;;  %s2416_s30 = sld [smem:[#allocation6 + $0x5f]] }
 0x121   :  { %v2252_v46 = vld.sshfl [vmem:[#allocation1] sm:$0xff pattern:$0x73625140]  ;;  %v2254_v28 = vld.sshfl [vmem:[#allocation1 + $0x8] sm:$0xff pattern:$0x73625140]  ;;  %v534_v3 = vmul.f32 %v2758_v11, %v2300_v15 }
 0x122   :  { %2743 = vst [vmem:[#allocation16_spill] sm:$0xff] %v2252_v46  ;;  %v838_v46 = vstv %s2174_s14  ;;  %s2297_s14 = sld [smem:[#allocation6 + $0x53]] }
 0x123   :  { %2744 = vst [vmem:[#allocation18_spill] sm:$0xff] %v2254_v28  ;;  %v839_v25 = vmul.f32 %v838_v46, %v2300_v15 }
 0x124   :  { %1032 = vst [vmem:[#allocation1] ss:$4 sm:$0xff] %v2745_v19  ;;  %v836_v19 = vmul.f32 %v835_v48, %v1798_v34  ;;  %v2290_v48 = vmul.f32 %v2747_v22, %v314_v63  ;;  %v330_v63 = vpop.permute.xlu0 %329  ;;  %v993_v22 = vmul.f32 %v2749_v59, %v1678_v9  ;;  %v2754_v59 = vstv %s2167_s13  ;;  %s1217_s13 = sld [smem:[#allocation6 + $0x2d]] }
 0x125   :  { %v332_v39 = vsel %vm331_vm14, %v2753_v38, %v330_v63  ;;  %v333_v2 = vsel %vm331_vm14, %v330_v63, %v2753_v38  ;;  %v1004_v18 = vmul.f32 %v2754_v59, %v1888_v37  ;;  %v2760_v38 = vstv %s2015_s2 }
 0x126   :  { %v2303_v43 = vadd.f32 %v836_v19, %v829_v55  ;;  %v428_v19 = vmul.f32 %v2750_v60, %v2290_v48  ;;  %v2751_v55 = vstv %s2160_s29  ;;  %v641_v60 = vmul.f32 %v2755_v42, %v2300_v15  ;;  %s2593_s29 = sld [smem:[#allocation6 + $0x57]] }
 0x127   :  { %v996_v50 = vmul.f32 %v2751_v55, %v1879_v33  ;;  %v2756_v55 = vstv %s1907_s25  ;;  %v535_v28 = vmul.f32 %v2757_v51, %v2290_v48  ;;  %v2759_v33 = vmov %v2755_v42  ;;  %v2761_v42 = vld [vmem:[#allocation21_spill] sm:$0xff]  ;;  %s2364_s25 = sld [smem:[#allocation6 + $0x5a]] }
 0x128   :  { %v427_v24 = vmul.f32 %v2756_v55, %v2300_v15  ;;  %v642_v63 = vmul.f32 %v2759_v33, %v2290_v48  ;;  %v948_v59 = vmul.f32 %v2760_v38, %v2300_v15  ;;  %v840_v31 = vmul.f32 %v838_v46, %v2290_v48  ;;  %v2762_v55 = vld [vmem:[#allocation22_spill] sm:$0xff] }
 0x129   :  { %v2357_v37 = vmul.f32 %v2761_v42, %v332_v39  ;;  %v2360_v9 = vmul.f32 %v2762_v55, %v333_v2  ;;  %v432_v51 = vadd.f32 %v428_v19, %v2189_v4  ;;  %v2686_v11 = vstv %s2297_s14  ;;  %v348_v19 = vpop.permute.xlu1 %347 }
 0x12a   :  { %v1006_v33 = vadd.f32 %v1001_v10, %v993_v22  ;;  %v1008_v38 = vadd.f32 %v1004_v18, %v996_v50  ;;  %v1016_v46 = vmul.f32 %v1015_v32, %v1945_v29  ;;  %v645_v39 = vadd.f32 %v641_v60, %v2192_v23 }
 0x12b   :  { %v431_v2 = vadd.f32 %v427_v24, %v2200_v21  ;;  %v2370_v42 = vadd.f32 %v535_v28, %v2208_v7  ;;  %v2373_v4 = vadd.f32 %v534_v3, %v2211_v53  ;;  %v2378_v22 = vadd.f32 %v642_v63, %v2224_v20 }
 0x12c   :  { %v2380_v32 = vadd.f32 %v948_v59, %v940_v13  ;;  %v2383_v23 = vadd.f32 %v840_v31, %v2269_v16  ;;  %v2385_v21 = vadd.f32 %v839_v25, %v831_v26  ;;  %v2763_v7 = vstv %s1975_s0  ;;  %v2770_v31 = vld [vmem:[#allocation24_spill] sm:$0xff]  ;;  %s2452_s0 = sld [smem:[#allocation6 + $0x61]] }
 0x12d   :  { %v437_v28 = vmul.f32 %v2763_v7, %v2360_v9  ;;  %v2764_v3 = vstv %s1981_s27  ;;  %v2765_v18 = vmov %v2763_v7  ;;  %v1046_v13 = vmul.f32 %v2686_v11, %v2107_v56  ;;  %v1034_v7 = vld.sshfl [vmem:[#allocation1 + $0x8] sm:$0xff pattern:$0x73625140]  ;;  %s1421_s27 = smov 1  }
 0x12e   :  { %v650_v53 = vmul.f32 %v2764_v3, %v2357_v37  ;;  %v436_v20 = vmul.f32 %v2765_v18, %v2357_v37  ;;  %v2766_v16 = vstv %s1984_s28  ;;  %v2402_v25 = vadd.f32 %v1055_v40, %v1048_v47  ;;  %v2769_v40 = vld [vmem:[#allocation23_spill] sm:$0xff]  ;;  %v2773_v18 = vld [vmem:[#allocation38_spill] sm:$0xff]  ;;  %s2492_s28 = sld [smem:[#allocation6 + $0x34]] }
 0x12f   :  { %v544_v61 = vmul.f32 %v2766_v16, %v2360_v9  ;;  %v1018_v26 = vadd.f32 %v1013_v45, %v1006_v33  ;;  %v2404_v50 = vadd.f32 %v1016_v46, %v1008_v38  ;;  %v351_v10 = vsel %vm331_vm14, %v348_v19, %v350_v49 }
 0x130   :  { %v352_v60 = vsel %vm331_vm14, %v350_v49, %v348_v19  ;;  %v2767_v24 = vmov %v2766_v16  ;;  %v2768_v59 = vmov %v2764_v3  ;;  %v2419_v45 = vmul.f32 %v2769_v40, %v351_v10  ;;  %v2430_v3 = vld.sshfl [vmem:[#allocation1] sm:$0xff pattern:$0x73625140]  ;;  %v2775_v10 = vld [vmem:[#allocation40_spill] sm:$0xff] }
 0x131   :  { %v543_v63 = vmul.f32 %v2767_v24, %v2357_v37  ;;  %v651_v47 = vmul.f32 %v2768_v59, %v2360_v9  ;;  %v2422_v55 = vmul.f32 %v2770_v31, %v352_v60  ;;  %v2771_v33 = vstv %s2062_s12  ;;  %v2774_v16 = vld [vmem:[#allocation39_spill] sm:$0xff]  ;;  %v2777_v31 = vld [vmem:[#allocation17_spill] sm:$0xff] }
 0x132   :  { %v957_v38 = vmul.f32 %v2771_v33, %v2357_v37  ;;  %v2772_v46 = vstv %s2248_s7  ;;  %v442_v19 = vadd.f32 %v437_v28, %v2773_v18  ;;  %v655_v24 = vadd.f32 %v650_v53, %v2774_v16  ;;  %1090 = vst [vmem:[#allocation1] ss:$4 sm:$0xff] %v2777_v31 }
 0x133   :  { %v849_v49 = vmul.f32 %v2772_v46, %v2360_v9  ;;  %v441_v59 = vadd.f32 %v436_v20, %v2775_v10  ;;  %v2776_v60 = vstv %s2214_s15  ;;  %v2778_v33 = vstv %s2093_s18  ;;  %s1423_s18 = smov 126   ;;  %s1426_s15 = smov [#allocation10]  }
 0x134   :  { %v1025_v40 = vmul.f32 %v2776_v60, %v1476_v30  ;;  %v440_v46 = vmul.f32 %v2778_v33, %v2422_v55  ;;  %v2779_v11 = vstv %s2216_s17  ;;  %v2780_v28 = vmov %v2778_v33 }
 0x135   :  { %v653_v41 = vmul.f32 %v2779_v11, %v2419_v45  ;;  %v439_v53 = vmul.f32 %v2780_v28, %v2419_v45  ;;  %v549_v18 = vadd.f32 %v544_v61, %v2053_v54  ;;  %v548_v20 = vadd.f32 %v543_v63, %v2078_v6 }
 0x136   :  { %v1038_v16 = vadd.f32 %v1034_v7, %v2305_v58  ;;  %v444_v31 = vadd.f32 %v440_v46, %v432_v51  ;;  %v2781_v30 = vstv %s2231_s4  ;;  %v2782_v54 = vstv %s2221_s19 }
 0x137   :  { %v657_v33 = vadd.f32 %v653_v41, %v645_v39  ;;  %v443_v11 = vadd.f32 %v439_v53, %v431_v2  ;;  %v1042_v28 = vmul.f32 %v2781_v30, %v1766_v36  ;;  %v547_v61 = vmul.f32 %v2782_v54, %v2422_v55 }
 0x138   :  { %v1029_v6 = vadd.f32 %v1025_v40, %v1018_v26  ;;  %v2783_v63 = vstv %s1748_s3  ;;  %v2784_v7 = vstv %s1754_s8  ;;  %v446_v60 = vadd.f32 %v444_v31, %v442_v19  ;;  %s2479_s3 = sld [smem:[#allocation6 + $0x3]]  ;;  %s1420_s8 = smov 3  }
 0x139   :  { %v885_v58 = vmul.f32 %v2783_v63, %v1681_v14  ;;  %v893_v10 = vmul.f32 %v2784_v7, %v1671_v8  ;;  %v659_v41 = vadd.f32 %v657_v33, %v655_v24  ;;  %v445_v51 = vadd.f32 %v443_v11, %v441_v59 }
 0x13a   :  { %v2785_v39 = vmov %v2782_v54  ;;  %v2786_v2 = vstv %s2216_s17  ;;  %v2787_v26 = vstv %s2248_s7  ;;  %v1050_v53 = vadd.f32 %v1046_v13, %v1038_v16  ;;  %449 = vrot.lane.b32.xlu1 %v446_v60, %s1420_s8  ;;  %s2526_s7 = sld [smem:[#allocation6 + $0x3b]]  ;;  %s1150_s17 = sshll.u32 %s1426_s15, 4  ;;  %s1151_s17 = int_to_ptr.vmem [resolvable:$true] %s1150_s17 }
 0x13b   :  { %v546_v30 = vmul.f32 %v2785_v39, %v2419_v45  ;;  %v654_v46 = vmul.f32 %v2786_v2, %v2422_v55  ;;  %v848_v40 = vmul.f32 %v2787_v26, %v2357_v37  ;;  %v2788_v54 = vstv %s2375_s26  ;;  %661 = vrot.lane.b32.xlu2 %v659_v41, %s1421_s27  ;;  %447 = vrot.lane.b32.xlu0 %v445_v51, %s1420_s8 }
 0x13c   :  { %v1067_v63 = vmul.f32 %v2788_v54, %v2360_v9  ;;  %v850_v19 = vstv %s2416_s30  ;;  %v2789_v24 = vstv %s2364_s25  ;;  %v2790_v31 = vstv %s1897_s21  ;;  %s2499_s21 = sld [smem:[#allocation6 + $0xa]] }
 0x13d   :  { %v1058_v59 = vmul.f32 %v2789_v24, %v2290_v48  ;;  %v888_v33 = vmul.f32 %v2790_v31, %v1882_v35  ;;  %v2791_v13 = vstv %s1905_s23  ;;  %v656_v60 = vadd.f32 %v651_v47, %v2109_v5  ;;  %s2798_s23 = sld [smem:[#allocation45_spill]] }
 0x13e   :  { %v896_v16 = vmul.f32 %v2791_v13, %v1891_v1  ;;  %v962_v11 = vadd.f32 %v957_v38, %v2245_v17  ;;  %v1047_v7 = vadd.f32 %v1042_v28, %v1029_v6  ;;  %v2792_v41 = vstv %s2241_s1  ;;  %s2558_s1 = sld [smem:[#allocation6 + $0x42]] }
 0x13f   :  { %v1054_v39 = vmul.f32 %v2792_v41, %v1798_v34  ;;  %v551_v2 = vadd.f32 %v547_v61, %v2370_v42  ;;  %v550_v26 = vadd.f32 %v546_v30, %v2373_v4  ;;  %v898_v54 = vadd.f32 %v893_v10, %v885_v58 }
 0x140   :  { %v2793_v51 = vstv %s1953_s22  ;;  %v658_v47 = vadd.f32 %v654_v46, %v2378_v22  ;;  %v854_v17 = vadd.f32 %v849_v49, %v2284_v52  ;;  %v853_v38 = vadd.f32 %v848_v40, %v2303_v43  ;;  %s2799_s22 = sld [smem:[#allocation46_spill]] }
 0x141   :  { %v905_v5 = vmul.f32 %v2793_v51, %v2739_v12  ;;  %v1068_v28 = vstv %s2452_s0  ;;  %v1062_v6 = vadd.f32 %v1058_v59, %v1050_v53  ;;  %v2511_v24 = vadd.f32 %v1067_v63, %v2402_v25  ;;  %v2804_v51 = vld [vmem:[#allocation29_spill] sm:$0xff] }
 0x142   :  { %v900_v31 = vadd.f32 %v896_v16, %v888_v33  ;;  %v2794_v42 = vstv %s1959_s24  ;;  %v2795_v10 = vstv %s2263_s9  ;;  %v852_v58 = vmul.f32 %v850_v19, %v2422_v55  ;;  %s2532_s24 = sld [smem:[#allocation6 + $0x11]] }
 0x143   :  { %v908_v4 = vmul.f32 %v2794_v42, %v1948_v62  ;;  %v960_v61 = vmul.f32 %v2795_v10, %v2419_v45  ;;  %v2796_v22 = vstv %s1966_s5  ;;  %v2797_v43 = vstv %s1973_s6  ;;  %s1422_s5 = smov 2   ;;  %s2551_s6 = sld [smem:[#allocation6 + $0x18]] }
 0x144   :  { %v917_v52 = vmul.f32 %v2796_v22, %v2742_v27  ;;  %v934_v49 = vmul.f32 %v2797_v43, %v1769_v0  ;;  %v553_v25 = vadd.f32 %v551_v2, %v549_v18  ;;  %v552_v30 = vadd.f32 %v550_v26, %v548_v20  ;;  %v2803_v26 = vld [vmem:[#allocation31_spill] sm:$0xff] }
 0x145   :  { %v1059_v46 = vadd.f32 %v1054_v39, %v1047_v7  ;;  %v910_v40 = vadd.f32 %v905_v5, %v898_v54  ;;  %v660_v53 = vadd.f32 %v658_v47, %v656_v60  ;;  %v851_v63 = vmul.f32 %v850_v19, %v2419_v45 }
 0x146   :  { %v1037_v59 = vadd.f32 %v2430_v3, %v2404_v50  ;;  %v685_v33 = vstv %s2479_s3  ;;  %556 = vrot.lane.b32.xlu2 %v553_v25, %s1422_s5  ;;  %554 = vrot.lane.b32.xlu1 %v552_v30, %s1422_s5  ;;  %v912_v13 = vadd.f32 %v908_v4, %v900_v31  ;;  %v2800_v18 = vstv %s2798_s23  ;;  %v2806_v4 = vld [vmem:[#allocation36_spill] sm:$0xff] }
 0x147   :  { %v937_v20 = vmul.f32 %v2800_v18, %v2107_v56  ;;  %v2801_v16 = vstv %s2799_s22  ;;  %v688_v7 = vstv %s2492_s28  ;;  %663 = vrot.lane.b32.xlu0 %v660_v53, %s1421_s27  ;;  %v964_v50 = vadd.f32 %v960_v61, %v2380_v32 }
 0x148   :  { %v946_v60 = vmul.f32 %v2801_v16, %v1801_v57  ;;  %v856_v3 = vadd.f32 %v852_v58, %v2383_v23  ;;  %v2802_v19 = vstv %s2297_s14  ;;  %v693_v39 = vstv %s2499_s21 }
 0x149   :  { %v1045_v41 = vmul.f32 %v2802_v19, %v2116_v44  ;;  %v921_v2 = vadd.f32 %v917_v52, %v910_v40  ;;  %v929_v54 = vadd.f32 %v2803_v26, %v912_v13  ;;  %v686_v5 = vmul.f32 %v685_v33, %v2804_v51  ;;  %v2810_v13 = vld [vmem:[#allocation28_spill] sm:$0xff] }
 0x14a   :  { %v687_v47 = vmul.f32 %v685_v33, %v1681_v14  ;;  %v855_v32 = vadd.f32 %v851_v63, %v2385_v21  ;;  %v2805_v23 = vstv %s2364_s25  ;;  %v689_v10 = vmul.f32 %v688_v7, %v2806_v4 }
 0x14b   :  { %v1049_v31 = vadd.f32 %v1045_v41, %v1037_v59  ;;  %v1057_v42 = vmul.f32 %v2805_v23, %v2300_v15  ;;  %v1070_v61 = vmul.f32 %v1068_v28, %v2422_v55  ;;  %v2807_v58 = vstv %s2375_s26 }
 0x14c   :  { %v1066_v22 = vmul.f32 %v2807_v58, %v2357_v37  ;;  %v2808_v14 = vstv %s2015_s2  ;;  %v690_v43 = vmul.f32 %v688_v7, %v1882_v35  ;;  %v966_v21 = vadd.f32 %v964_v50, %v962_v11  ;;  %s2576_s2 = sld [smem:[#allocation6 + $0x1f]] }
 0x14d   :  { %v949_v52 = vmul.f32 %v2808_v14, %v2290_v48  ;;  %v858_v25 = vadd.f32 %v856_v3, %v854_v17  ;;  %v1069_v30 = vmul.f32 %v1068_v28, %v2419_v45  ;;  %v696_v40 = vstv %s2526_s7 }
 0x14e   :  { %v939_v53 = vadd.f32 %v934_v49, %v921_v2  ;;  %v941_v63 = vadd.f32 %v937_v20, %v929_v54  ;;  %v2809_v59 = vstv %s2263_s9  ;;  %v694_v18 = vmul.f32 %v693_v39, %v2810_v13  ;;  %968 = vrot.lane.b32.xlu2 %v966_v21, %s1423_s18  ;;  %v2812_v20 = vld [vmem:[#allocation37_spill] sm:$0xff]  ;;  %v2813_v2 = vld [vmem:[#allocation30_spill] sm:$0xff]  ;;  %s2830_s9 = sld [smem:[#allocation49_spill]] }
 0x14f   :  { %v961_v33 = vmul.f32 %v2809_v59, %v2422_v55  ;;  %v857_v16 = vadd.f32 %v855_v32, %v853_v38  ;;  %v1061_v19 = vadd.f32 %v1057_v42, %v1049_v31  ;;  %v695_v41 = vmul.f32 %v693_v39, %v1671_v8  ;;  %861 = vrot.lane.b32.xlu1 %v858_v25, %s1424_s10  ;;  %v2816_v59 = vld [vmem:[#allocation44_spill] sm:$0xff] }
 0x150   :  { %v705_v26 = vstv %s2532_s24  ;;  %v1074_v35 = vadd.f32 %v1070_v61, %v1062_v6  ;;  %v1071_v11 = vadd.f32 %v1066_v22, %v1059_v46  ;;  %v953_v17 = vadd.f32 %v949_v52, %v941_v63 }
 0x151   :  { %859 = vrot.lane.b32.xlu0 %v857_v16, %s1424_s10  ;;  %v1073_v28 = vadd.f32 %v1069_v30, %v1061_v19  ;;  %v2811_v38 = vstv %s2062_s12  ;;  %v697_v8 = vmul.f32 %v696_v40, %v2812_v20  ;;  %v698_v7 = vmul.f32 %v696_v40, %v1891_v1  ;;  %s2591_s12 = sld [smem:[#allocation6 + $0x26]] }
 0x152   :  { %v958_v49 = vmul.f32 %v2811_v38, %v2360_v9  ;;  %v951_v50 = vadd.f32 %v946_v60, %v939_v53  ;;  %v965_v3 = vadd.f32 %v961_v33, %v953_v17  ;;  %v699_v39 = vadd.f32 %v694_v18, %v686_v5  ;;  %v2815_v53 = vld [vmem:[#allocation43_spill] sm:$0xff] }
 0x153   :  { %v706_v54 = vmul.f32 %v705_v26, %v2813_v2  ;;  %v700_v6 = vadd.f32 %v695_v41, %v687_v47  ;;  %v707_v46 = vmul.f32 %v705_v26, %v2739_v12  ;;  %v708_v51 = vstv %s2558_s1  ;;  %v2814_v12 = vld [vmem:[#allocation15_spill] sm:$0xff] }
 0x154   :  { %v717_v32 = vstv %s2551_s6  ;;  %v1076_v31 = vadd.f32 %v1074_v35, %v2511_v24  ;;  %v1075_v23 = vadd.f32 %v1073_v28, %v1071_v11  ;;  %v963_v42 = vadd.f32 %v958_v49, %v951_v50  ;;  %s1152_s14 = sshll.u32 %s2830_s9, 4  ;;  %s1153_s14 = int_to_ptr.hbm [resolvable:$true] %s1152_s14 }
 0x155   :  { %v701_v1 = vadd.f32 %v697_v8, %v689_v10  ;;  %v702_v4 = vadd.f32 %v698_v7, %v690_v43  ;;  %v709_v60 = vmul.f32 %v708_v51, %v1945_v29  ;;  %v710_v5 = vmul.f32 %v708_v51, %v1948_v62 }
 0x156   :  { %v711_v47 = vadd.f32 %v706_v54, %v699_v39  ;;  %v718_v61 = vmul.f32 %v717_v32, %v2814_v12  ;;  %v967_v58 = vadd.f32 %v965_v3, %v963_v42  ;;  %v712_v22 = vadd.f32 %v707_v46, %v700_v6  ;;  %1079 = vrot.lane.b32.xlu2 %v1076_v31, %s1425_s20  ;;  %v2817_v46 = vld [vmem:[#allocation25_spill] sm:$0xff] }
 0x157   :  { %v719_v24 = vmul.f32 %v717_v32, %v2742_v27  ;;  %v734_v14 = vstv %s2576_s2  ;;  %1077 = vrot.lane.b32.xlu1 %v1075_v23, %s1425_s20  ;;  %v737_v10 = vstv %s2584_s11  ;;  %v713_v29 = vadd.f32 %v709_v60, %v701_v1  ;;  %v2818_v60 = vld [vmem:[#allocation41_spill] sm:$0xff] }
 0x158   :  { %v714_v52 = vadd.f32 %v710_v5, %v702_v4  ;;  %v722_v62 = vadd.f32 %v718_v61, %v711_v47  ;;  %v735_v43 = vmul.f32 %v734_v14, %v1766_v36  ;;  %v736_v25 = vmul.f32 %v734_v14, %v1769_v0  ;;  %v2819_v47 = vld [vmem:[#allocation42_spill] sm:$0xff]  ;;  %v2821_v14 = vld [vmem:[#allocation27_spill] sm:$0xff] }
 0x159   :  { %970 = vrot.lane.b32.xlu0 %v967_v58, %s1423_s18  ;;  %v723_v21 = vadd.f32 %v719_v24, %v712_v22  ;;  %v746_v30 = vstv %s2591_s12  ;;  %v738_v27 = vmul.f32 %v737_v10, %v2116_v44  ;;  %v749_v40 = vstv %s2593_s29  ;;  %v2820_v22 = vld [vmem:[#allocation26_spill] sm:$0xff] }
 0x15a   :  { %v730_v63 = vadd.f32 %v2815_v53, %v713_v29  ;;  %v731_v33 = vadd.f32 %v2816_v59, %v714_v52  ;;  %v739_v13 = vmul.f32 %v737_v10, %v2107_v56  ;;  %v740_v18 = vadd.f32 %v735_v43, %v722_v62  ;;  %v2822_v29 = vld [vmem:[#allocation47_spill] sm:$0xff]  ;;  %v2823_v62 = vld [vmem:[#allocation48_spill] sm:$0xff]  ;;  %v1092_v59 = vld.sshfl [vmem:[#allocation1 + $0x8] sm:$0xff pattern:$0x73625140] }
 0x15b   :  { %v741_v16 = vadd.f32 %v736_v25, %v723_v21  ;;  %v747_v19 = vmul.f32 %v746_v30, %v1798_v34  ;;  %v748_v36 = vmul.f32 %v746_v30, %v1801_v57  ;;  %v758_v41 = vstv %s1217_s13  ;;  %v2824_v21 = vld [vmem:[#allocation32_spill] sm:$0xff]  ;;  %v2825_v30 = vld [vmem:[#allocation33_spill] sm:$0xff] }
 0x15c   :  { %v750_v0 = vmul.f32 %v749_v40, %v2300_v15  ;;  %v751_v26 = vmul.f32 %v749_v40, %v2290_v48  ;;  %v742_v35 = vadd.f32 %v738_v27, %v730_v63  ;;  %v743_v44 = vadd.f32 %v739_v13, %v731_v33  ;;  %v1091_v63 = vld.sshfl [vmem:[#allocation1] sm:$0xff pattern:$0x73625140] }
 0x15d   :  { %v759_v11 = vmul.f32 %v758_v41, %v2357_v37  ;;  %v760_v17 = vmul.f32 %v758_v41, %v2360_v9  ;;  %v752_v28 = vadd.f32 %v747_v19, %v740_v18  ;;  %v753_v38 = vadd.f32 %v748_v36, %v741_v16 }
 0x15e   :  { %v761_v56 = vstv %s1218_s16  ;;  %v754_v49 = vadd.f32 %v750_v0, %v742_v35  ;;  %v755_v20 = vadd.f32 %v751_v26, %v743_v44  ;;  %vm665_vm15 = vcmp.lt.s32.totalorder %v2817_v46, 1 }
 0x15f   :  { %v762_v34 = vmul.f32 %v761_v56, %v2419_v45  ;;  %v763_v57 = vmul.f32 %v761_v56, %v2422_v55  ;;  %v764_v8 = vadd.f32 %v759_v11, %v752_v28  ;;  %v765_v7 = vadd.f32 %v760_v17, %v753_v38  ;;  %v2826_v28 = vld [vmem:[#allocation16_spill] sm:$0xff]  ;;  %v2827_v56 = vld [vmem:[#allocation18_spill] sm:$0xff] }
 0x160   :  { %vm451_vm1 = vcmp.lt.s32.totalorder %v2817_v46, 3  ;;  %vm863_vm2 = vcmp.lt.s32.totalorder %v2817_v46, 127  ;;  %vm558_vm3 = vcmp.lt.s32.totalorder %v2817_v46, 2  ;;  %vm1081_vm4 = vcmp.lt.s32.totalorder %v2817_v46, 125 }
 0x161   :  { %v766_v15 = vadd.f32 %v762_v34, %v754_v49  ;;  %v767_v50 = vadd.f32 %v763_v57, %v755_v20  ;;  %vm972_vm5 = vcmp.lt.s32.totalorder %v2817_v46, 126 }
 0x163   :  { %v768_v48 = vadd.f32 %v766_v15, %v764_v8  ;;  %v769_v3 = vadd.f32 %v767_v50, %v765_v7 }
 0x195   :  { %v662_v39 = vpop.permute.xlu2 %661 }
 0x1a0   :  { %v557_v54 = vpop.permute.xlu2 %556 }
 0x1a8   :  { %v969_v51 = vpop.permute.xlu2 %968 }
 0x1ac   :  { %v450_v2 = vpop.permute.xlu1 %449 }
 0x1ad   :  { %v448_v37 = vpop.permute.xlu0 %447 }
 0x1ae   :  { %v452_v23 = vsel %vm451_vm1, %v448_v37, %v450_v2  ;;  %v453_v42 = vsel %vm451_vm1, %v450_v2, %v448_v37 }
 0x1af   :  { %v465_v24 = vmul.f32 %v2820_v22, %v453_v42  ;;  %v466_v10 = vmul.f32 %v2821_v14, %v452_v23 }
 0x1b0   :  { %v1080_v33 = vpop.permute.xlu2 %1079 }
 0x1b8   :  { %v555_v9 = vpop.permute.xlu1 %554 }
 0x1b9   :  { %v664_v6 = vpop.permute.xlu0 %663  ;;  %v559_v61 = vsel %vm558_vm3, %v555_v9, %v557_v54  ;;  %v560_v58 = vsel %vm558_vm3, %v557_v54, %v555_v9 }
 0x1ba   :  { %v666_v45 = vsel %vm665_vm15, %v662_v39, %v664_v6  ;;  %v667_v55 = vsel %vm665_vm15, %v664_v6, %v662_v39  ;;  %v572_v25 = vmul.f32 %v2824_v21, %v560_v58  ;;  %v573_v27 = vmul.f32 %v2825_v30, %v559_v61 }
 0x1bb   :  { %v679_v5 = vmul.f32 %v2818_v60, %v667_v55  ;;  %v680_v12 = vmul.f32 %v2819_v47, %v666_v45 }
 0x1bc   :  { %v770_v11 = vadd.f32 %v768_v48, %v572_v25  ;;  %v771_v17 = vadd.f32 %v769_v3, %v573_v27 }
 0x1bd   :  { %v681_v40 = vadd.f32 %v679_v5, %v465_v24  ;;  %v682_v53 = vadd.f32 %v680_v12, %v466_v10 }
 0x1c1   :  { %v862_v32 = vpop.permute.xlu1 %861 }
 0x1c3   :  { %v860_v31 = vpop.permute.xlu0 %859 }
 0x1c4   :  { %v864_v1 = vsel %vm863_vm2, %v860_v31, %v862_v32  ;;  %v865_v4 = vsel %vm863_vm2, %v862_v32, %v860_v31 }
 0x1c5   :  { %v877_v52 = vmul.f32 %v2822_v29, %v864_v1  ;;  %v878_v43 = vmul.f32 %v2823_v62, %v865_v4 }
 0x1c7   :  { %v879_v18 = vadd.f32 %v877_v52, %v681_v40  ;;  %v880_v16 = vadd.f32 %v878_v43, %v682_v53 }
 0x1c9   :  { %v1078_v13 = vpop.permute.xlu1 %1077 }
 0x1ca   :  { %v1082_v19 = vsel %vm1081_vm4, %v1078_v13, %v1080_v33  ;;  %v1083_v36 = vsel %vm1081_vm4, %v1080_v33, %v1078_v13 }
 0x1cb   :  { %v971_v41 = vpop.permute.xlu0 %970  ;;  %v1095_v0 = vmul.f32 %v1091_v63, %v1082_v19  ;;  %v1096_v26 = vmul.f32 %v1092_v59, %v1083_v36 }
 0x1cc   :  { %v973_v35 = vsel %vm972_vm5, %v969_v51, %v971_v41  ;;  %v974_v44 = vsel %vm972_vm5, %v971_v41, %v969_v51 }
 0x1cd   :  { %v986_v38 = vmul.f32 %v2826_v28, %v973_v35  ;;  %v987_v49 = vmul.f32 %v2827_v56, %v974_v44  ;;  %v1097_v20 = vadd.f32 %v1095_v0, %v879_v18  ;;  %v1098_v34 = vadd.f32 %v1096_v26, %v880_v16 }
 0x1cf   :  { %v988_v57 = vadd.f32 %v986_v38, %v770_v11  ;;  %v989_v8 = vadd.f32 %v987_v49, %v771_v17 }
 0x1d1   :  { %v1099_v7 = vadd.f32 %v1097_v20, %v988_v57  ;;  %v1100_v15 = vadd.f32 %v1098_v34, %v989_v8 }
 0x1d3   :  { %v1261_v50 = vmul.f32 -1.442695, %v1099_v7  ;;  %v1262_v39 = vmul.f32 -1.442695, %v1100_v15 }
 0x1d5   :  { %1283 = vpow2.f32 %v1261_v50 }
 0x1d6   :  { %1285 = vpow2.f32 %v1262_v39 }
 0x1db   :  { %v1284_v2 = vpop.eup %1283 }
 0x1dc   :  { %v1286_v37 = vpop.eup %1285  ;;  %v1107_v54 = vadd.f32 1.0, %v1284_v2 }
 0x1dd   :  { %v1108_v9 = vadd.f32 1.0, %v1286_v37 }
 0x1de   :  { %1287 = vrcp.f32 %v1107_v54  ;;  %vm1114_vm8 = vweird.f32 %v1107_v54  ;;  %v1120_v1 = vand.u32 2147483648, %v1107_v54  ;;  %v1118_v60 = vand.u32 2147483647, %v1107_v54 }
 0x1df   :  { %1289 = vrcp.f32 %v1108_v9  ;;  %v1135_v32 = vand.u32 2147483648, %v1108_v9  ;;  %v1133_v23 = vand.u32 2147483647, %v1108_v9  ;;  %vm1129_vm10 = vweird.f32 %v1108_v9 }
 0x1e0   :  { %v1121_v58 = vor.u32 1.1754944e-38, %v1120_v1  ;;  %vm1119_vm13 = vcmp.eq.f32.partialorder %v1118_v60, 8.507059e+37 }
 0x1e1   :  { %v1136_v47 = vor.u32 1.1754944e-38, %v1135_v32  ;;  %vm1134_vm12 = vcmp.eq.f32.partialorder %v1133_v23, 8.507059e+37 }
 0x1e4   :  { %v1288_v48 = vpop.eup %1287 }
 0x1e5   :  { %v1290_v3 = vpop.eup %1289  ;;  %v1110_v6 = vmul.f32 %v1288_v48, %v1107_v54  ;;  %vm1115_vm6 = vweird.f32 %v1288_v48 }
 0x1e6   :  { %v1125_v46 = vmul.f32 %v1290_v3, %v1108_v9  ;;  %vm1130_vm7 = vweird.f32 %v1290_v3  ;;  %vm2638_vm9 = vmor %vm1114_vm8, %vm1115_vm6 }
 0x1e7   :  { %v1111_v51 = vsub.f32 1.0, %v1110_v6  ;;  %vm1131_vm11 = vmor %vm1129_vm10, %vm1130_vm7 }
 0x1e8   :  { %v1126_v45 = vsub.f32 1.0, %v1125_v46 }
 0x1e9   :  { %v1112_v55 = vmul.f32 %v1288_v48, %v1111_v51 }
 0x1ea   :  { %v1127_v31 = vmul.f32 %v1290_v3, %v1126_v45 }
 0x1eb   :  { %v1113_v42 = vadd.f32 %v1288_v48, %v1112_v55 }
 0x1ec   :  { %v1128_v5 = vadd.f32 %v1290_v3, %v1127_v31 }
 0x1ed   :  { %v1117_v12 = vsel %vm2638_vm9, %v1288_v48, %v1113_v42 }
 0x1ee   :  { %v1132_v61 = vsel %vm1131_vm11, %v1290_v3, %v1128_v5  ;;  %v1122_v14 = vsel %vm1119_vm13, %v1121_v58, %v1117_v12 }
 0x1ef   :  { %v1137_v22 = vsel %vm1134_vm12, %v1136_v47, %v1132_v61 }
 0x1f0   :  { %v1141_v24 = vrot.slane %v1137_v22, 6 }
 0x1f2   :  { %v1142_v10 = vsel %vm103_vm0, %v1122_v14, %v1141_v24 }
 0x1f3   :  { %1144 = vst [vmem:[#allocation10] sm:$0xf] %v1142_v10 }
 0x1f4   :  { %1155 = dma.vmem_to_hbm [thread:$0]  %s1151_s17, 64, %s1153_s14, [#allocation4]  }
 0x1f5   :  { %1405 = dma.done.wait [#allocation4], 64  }
 0x1f6   :  { %1406 = vsyncadd [#allocation4], 4294967232 }
 0x1f7   :  { %1160 = vsyncpa [#allocation3], 1 }
 0x1f8   :  { %1161 = vsyncpa [#allocation8], 1 }
 0x1f9   :  { %1162 = vsyncpa [#allocation4], 1 }
 0x1fa   :  { %1163 = vsyncpa [#allocation5], 1 }

</bundles_post_ra>
